<compile_context>
chip_gen: v6e
topology: v6e:2x2x1
jax: 0.10.0
libtpu: 0.0.40
codegen_flags: <defaults>
</compile_context>

<pallas_src>
import functools

import numpy as np

import jax
import jax.numpy as jnp
from jax.experimental import pallas as pl
from jax.experimental.pallas import tpu as pltpu


_K = 5  # conv kernel size for both conv layers


# ----------------------------------------------------------------------------
# Fused kernel: one batch tile end-to-end
# ----------------------------------------------------------------------------
def _lenet_fused_kernel(x_ref, c1e_ref, c1o_ref, c1b_ref,
                        c2e_ref, c2o_ref, c2b_ref,
                        w1_ref, b1_ref, w2_ref, b2_ref, w3_ref, b3_ref,
                        o_ref, s1_ref, s2_ref, *, tb):
    """Per grid step: tb images.

      x_ref  : (tb*32, 32) f32   image rows, flattened (image, height)
      c1e/c1o: (5, 32, 84) bf16  conv1 banded weights (even / odd out columns)
      c2e/c2o: (5, 84, 80) bf16  conv2 banded weights
      w1     : (5, 80, 120) bf16 fc1 weight split per pooled-height row
      w2     : (120, 84) bf16    fc2 weight (in, out)
      w3     : (84, 128) bf16    fc3 weight padded to 128 lanes
      biases : f32 rows; fc3 bias pads are -1e30
      o_ref  : (tb, 128) f32     softmax probabilities (cols 10.. are 0)
      s1_ref : (tb*32, 84) f32   conv1 width-pooled + ReLU (scratch)
      s2_ref : (tb*16, 80) f32   conv2 width-pooled + ReLU (scratch)
    """
    f32 = jnp.float32
    r1 = tb * 32
    l1 = r1 - (_K - 1)          # conv1 rows computed; per-image rows 28..31 invalid
    r2 = tb * 16
    l2 = r2 - (_K - 1)          # conv2 rows computed; per-image rows 10..15 invalid

    def mm(a, w):               # bf16 MXU inputs, f32 accumulation
        return jnp.dot(a.astype(w.dtype), w, preferred_element_type=f32)

    # ---- conv1 (5x5, 1->6) + bias + ReLU + width max-pool -------------------
    # Batch collapsed into M: each kh term is one (tb*32-4, 32) @ (32, 84)
    # matmul on row-shifted views of the flattened image rows.
    xs = x_ref[pl.ds(0, l1), :]
    acc_e = mm(xs, c1e_ref[0])
    acc_o = mm(xs, c1o_ref[0])
    for kh in range(1, _K):
        xs = x_ref[pl.ds(kh, l1), :]
        acc_e += mm(xs, c1e_ref[kh])
        acc_o += mm(xs, c1o_ref[kh])
    # width pool = even/odd max; bias added once after the max (they commute).
    y1 = jnp.maximum(jnp.maximum(acc_e, acc_o) + c1b_ref[...], 0.0)
    s1_ref[pl.ds(0, l1), :] = y1
    s1_ref[pl.ds(l1, _K - 1), :] = jnp.zeros((_K - 1, y1.shape[1]), f32)

    # ---- conv2 (5x5, 6->16); conv1 height pool folded into strided reads ----
    # pooled1[b, i] = max(y1[b*32 + 2i], y1[b*32 + 2i + 1]); conv2 output row
    # j = b*16 + h needs pooled1[b, h + kh]  ->  stride-2 reads from s1.
    def pooled1(kh):
        ev = s1_ref[pl.ds(2 * kh, l2, stride=2), :]
        od = s1_ref[pl.ds(2 * kh + 1, l2, stride=2), :]
        return jnp.maximum(ev, od)

    p = pooled1(0)
    acc_e = mm(p, c2e_ref[0])
    acc_o = mm(p, c2o_ref[0])
    for kh in range(1, _K):
        p = pooled1(kh)
        acc_e += mm(p, c2e_ref[kh])
        acc_o += mm(p, c2o_ref[kh])
    y2 = jnp.maximum(jnp.maximum(acc_e, acc_o) + c2b_ref[...], 0.0)
    s2_ref[pl.ds(0, l2), :] = y2
    s2_ref[pl.ds(l2, _K - 1), :] = jnp.zeros((_K - 1, y2.shape[1]), f32)

    # ---- fc1 + ReLU -> fc2 + ReLU -> fc3 -> softmax --------------------------
    # conv2 height pool folded into fc1's reads: pooled2[b, i] comes from s2
    # rows b*16 + 2i / +1 (stride-16 over the batch), and fc1 is computed as
    # sum_i pooled2[:, i, :] @ W1[i] -- no (tb, 400) reshape needed.
    acc = None
    for i in range(_K):
        ev = s2_ref[pl.ds(2 * i, tb, stride=16), :]
        od = s2_ref[pl.ds(2 * i + 1, tb, stride=16), :]
        t = mm(jnp.maximum(ev, od), w1_ref[i])
        acc = t if acc is None else acc + t
    h = jnp.maximum(acc + b1_ref[...], 0.0)                      # (tb, 120)
    h = jnp.maximum(mm(h, w2_ref[...]) + b2_ref[...], 0.0)       # (tb, 84)
    z = mm(h, w3_ref[...]) + b3_ref[...]                         # (tb, 128); pads -> -1e30
    z = z - jnp.max(z, axis=-1, keepdims=True)
    e = jnp.exp(z)
    o_ref[...] = (e / jnp.sum(e, axis=-1, keepdims=True)).astype(o_ref.dtype)


# ----------------------------------------------------------------------------
# Forward pass wrapper (single pallas_call)
# ----------------------------------------------------------------------------
def _tile_batch(b):
    if b <= 64:
        return b
    if b <= 512:
        return 64       # >= 2 grid steps -> both v7x TensorCores get work
    return 128


@jax.jit
def lenet_forward(kp, x):
    """x: (B, 1, 32, 32) float32 NCHW -> (B, 10) softmax probabilities."""
    b = x.shape[0]
    tb = _tile_batch(b)
    bp = ((b + tb - 1) // tb) * tb
    xr = x.reshape(b, 32, 32)
    if bp != b:
        xr = jnp.concatenate([xr, jnp.zeros((bp - b, 32, 32), xr.dtype)], axis=0)
    xf = xr.reshape(bp * 32, 32)         # flattened (image, row) layout

    def full(a):
        n = a.ndim
        return pl.BlockSpec(a.shape, lambda i, _n=n: (0,) * _n)

    kernel = functools.partial(_lenet_fused_kernel, tb=tb)
    out = pl.pallas_call(
        kernel,
        grid=(bp // tb,),
        in_specs=[
            pl.BlockSpec((tb * 32, 32), lambda i: (i, 0)),
            full(kp["c1_we"]), full(kp["c1_wo"]), full(kp["c1_b"]),
            full(kp["c2_we"]), full(kp["c2_wo"]), full(kp["c2_b"]),
            full(kp["fc1_w"]), full(kp["fc1_b"]),
            full(kp["fc2_w"]), full(kp["fc2_b"]),
            full(kp["fc3_w"]), full(kp["fc3_b"]),
        ],
        out_specs=pl.BlockSpec((tb, 128), lambda i: (i, 0)),
        out_shape=jax.ShapeDtypeStruct((bp, 128), jnp.float32),
        scratch_shapes=[
            pltpu.VMEM((tb * 32, 84), jnp.float32),   # conv1 ReLU'd, width-pooled
            pltpu.VMEM((tb * 16, 80), jnp.float32),   # conv2 ReLU'd, width-pooled
        ],
        compiler_params=pltpu.CompilerParams(
            dimension_semantics=("parallel",)),
    )(xf, kp["c1_we"], kp["c1_wo"], kp["c1_b"],
      kp["c2_we"], kp["c2_wo"], kp["c2_b"],
      kp["fc1_w"], kp["fc1_b"], kp["fc2_w"], kp["fc2_b"],
      kp["fc3_w"], kp["fc3_b"])
    return out[:b, :10]


# ----------------------------------------------------------------------------
# Parameters: PyTorch-layout init + one-time conversion to kernel layout
# ----------------------------------------------------------------------------
def init_lenet_params(key):
    """PyTorch-layout parameters (Conv2d: (Cout,Cin,K,K); Linear: (out,in))."""
    ks = jax.random.split(key, 10)

    def u(k, shape, fan_in):
        bound = float(1.0 / np.sqrt(fan_in))
        return jax.random.uniform(k, shape, jnp.float32, -bound, bound)

    return {
        "w_conv1": u(ks[0], (6, 1, 5, 5), 25),
        "b_conv1": u(ks[1], (6,), 25),
        "w_conv2": u(ks[2], (16, 6, 5, 5), 150),
        "b_conv2": u(ks[3], (16,), 150),
        "w_fc1": u(ks[4], (120, 400), 400),
        "b_fc1": u(ks[5], (120,), 400),
        "w_fc2": u(ks[6], (84, 120), 120),
        "b_fc2": u(ks[7], (84,), 120),
        "w_fc3": u(ks[8], (10, 84), 84),
        "b_fc3": u(ks[9], (10,), 84),
    }


def _build_banded_conv_weights(w, w_in):
    """Banded matrices so that conv == sum_kh  x[kh:kh+Ho, :] @ band[kh].

    x rows use the per-image (H, W*Cin) layout (column j = w*Cin + cin).  Two
    bands are returned: even conv output columns (w_out = 2i) and odd ones
    (w_out = 2i+1); the width pool is then max(even, odd).  Output columns are
    ordered (w_pooled, cout), i.e. exactly the next layer's input layout.
    Assumes even conv output width (true for LeNet: 28 and 10).
    """
    w_np = np.asarray(w, np.float32)            # (Cout, Cin, K, K)
    cout, cin, k, _ = w_np.shape
    wo = w_in - k + 1
    wp = wo // 2
    be = np.zeros((k, w_in * cin, wp * cout), np.float32)
    bo = np.zeros((k, w_in * cin, wp * cout), np.float32)
    for kh in range(k):
        for kw in range(k):
            blk = w_np[:, :, kh, kw].T          # (Cin, Cout)
            for i in range(wp):
                e_in = (2 * i + kw) * cin           # feeds even output col 2i
                o_in = (2 * i + 1 + kw) * cin       # feeds odd  output col 2i+1
                be[kh, e_in:e_in + cin, i * cout:(i + 1) * cout] = blk
                bo[kh, o_in:o_in + cin, i * cout:(i + 1) * cout] = blk
    return be, bo


def prepare_lenet_params(params):
    """One-time conversion of PyTorch-layout params to the kernel layout."""
    bf16 = jnp.bfloat16
    p = {}
    # conv1: 32x32x1 -> 28x28x6 -> pool -> 14x14x6
    be, bo = _build_banded_conv_weights(params["w_conv1"], 32)
    p["c1_we"], p["c1_wo"] = jnp.asarray(be, bf16), jnp.asarray(bo, bf16)
    p["c1_b"] = jnp.asarray(
        np.tile(np.asarray(params["b_conv1"], np.float32), 14)[None, :])
    # conv2: 14x14x6 -> 10x10x16 -> pool -> 5x5x16
    be, bo = _build_banded_conv_weights(params["w_conv2"], 14)
    p["c2_we"], p["c2_wo"] = jnp.asarray(be, bf16), jnp.asarray(bo, bf16)
    p["c2_b"] = jnp.asarray(
        np.tile(np.asarray(params["b_conv2"], np.float32), 5)[None, :])
    # fc1: PyTorch columns are the NCHW flatten (c*25 + h*5 + w); our pooled2
    # rows are indexed by h with columns (w*16 + c), so split per h into
    # (5, 80, 120) chunks: chunk[h][w*16 + c, out] = W[out, c*25 + h*5 + w].
    w1 = np.asarray(params["w_fc1"], np.float32).reshape(120, 16, 5, 5)
    w1 = np.transpose(w1, (2, 3, 1, 0)).reshape(5, 80, 120)
    p["fc1_w"] = jnp.asarray(w1, bf16)
    p["fc1_b"] = jnp.asarray(params["b_fc1"], jnp.float32).reshape(1, -1)
    p["fc2_w"] = jnp.asarray(np.asarray(params["w_fc2"], np.float32).T, bf16)
    p["fc2_b"] = jnp.asarray(params["b_fc2"], jnp.float32).reshape(1, -1)
    # fc3 padded to 128 output lanes (lane-dense stores); padded bias slots are
    # -1e30 so exp() of the pads is 0 and the softmax denominator is unchanged.
    w3 = np.zeros((84, 128), np.float32)
    w3[:, :10] = np.asarray(params["w_fc3"], np.float32).T
    b3 = np.full((1, 128), -1e30, np.float32)
    b3[0, :10] = np.asarray(params["b_fc3"], np.float32)
    p["fc3_w"] = jnp.asarray(w3, bf16)
    p["fc3_b"] = jnp.asarray(b3)
    return p


# ----------------------------------------------------------------------------
# Pure-JAX reference with PyTorch semantics (correctness check only)
# ----------------------------------------------------------------------------
def lenet_reference(params, x):
    prec = jax.lax.Precision.HIGHEST

    def conv(x, w, b):
        y = jax.lax.conv_general_dilated(
            x, w, window_strides=(1, 1), padding="VALID",
            dimension_numbers=("NCHW", "OIHW", "NCHW"), precision=prec)
        return jax.nn.relu(y + b[None, :, None, None])

    def pool(x):
        return jax.lax.reduce_window(x, -jnp.inf, jax.lax.max,
                                     (1, 1, 2, 2), (1, 1, 2, 2), "VALID")

    y = pool(conv(x, params["w_conv1"], params["b_conv1"]))
    y = pool(conv(y, params["w_conv2"], params["b_conv2"]))
    y = y.reshape(y.shape[0], -1)                                  # NCHW flatten
    y = jax.nn.relu(jnp.dot(y, params["w_fc1"].T, precision=prec) + params["b_fc1"])
    y = jax.nn.relu(jnp.dot(y, params["w_fc2"].T, precision=prec) + params["b_fc2"])
    z = jnp.dot(y, params["w_fc3"].T, precision=prec) + params["b_fc3"]
    return jax.nn.softmax(z, axis=-1)


if __name__ == "__main__":
    key = jax.random.PRNGKey(0)
    k_param, k_in = jax.random.split(key)
    params = init_lenet_params(k_param)
    kparams = prepare_lenet_params(params)

    # LeNet-5 needs 32x32 single-channel input for the 16*5*5 flatten.
    x = jax.random.normal(k_in, (2, 1, 32, 32), jnp.float32)

    out = jax.block_until_ready(lenet_forward(kparams, x))
    assert out.shape == (2, 10)
    # Exact-division softmax -> rows sum to 1 to f32 accuracy.
    assert bool(jnp.allclose(jnp.sum(out, axis=-1), 1.0, atol=1e-3))
    # Match the plain-JAX / PyTorch-semantics reference (bf16 MXU inputs).
    ref = jax.block_until_ready(lenet_reference(params, x))
    max_err = float(jnp.max(jnp.abs(out - ref)))
    assert max_err < 2e-2, f"Pallas LeNet mismatch vs reference: {max_err}"
    print("KERNEL_OK")
</pallas_src>

<mosaic_0001>
module attributes {stable_mosaic.version = 11 : i64} {
  func.func @_lenet_fused_kernel(%arg0: i32, %arg1: memref<64x32xf32, #tpu.memory_space<vmem>>, %arg2: memref<5x32x84xbf16, #tpu.memory_space<vmem>>, %arg3: memref<5x32x84xbf16, #tpu.memory_space<vmem>>, %arg4: memref<1x84xf32, #tpu.memory_space<vmem>>, %arg5: memref<5x84x80xbf16, #tpu.memory_space<vmem>>, %arg6: memref<5x84x80xbf16, #tpu.memory_space<vmem>>, %arg7: memref<1x80xf32, #tpu.memory_space<vmem>>, %arg8: memref<5x80x120xbf16, #tpu.memory_space<vmem>>, %arg9: memref<1x120xf32, #tpu.memory_space<vmem>>, %arg10: memref<120x84xbf16, #tpu.memory_space<vmem>>, %arg11: memref<1x84xf32, #tpu.memory_space<vmem>>, %arg12: memref<84x128xbf16, #tpu.memory_space<vmem>>, %arg13: memref<1x128xf32, #tpu.memory_space<vmem>>, %arg14: memref<2x128xf32, #tpu.memory_space<vmem>>, %arg15: memref<64x84xf32, #tpu.memory_space<vmem>>, %arg16: memref<32x80xf32, #tpu.memory_space<vmem>>) attributes {dimension_semantics = [#tpu.dimension_semantics<parallel>], iteration_bounds = array<i64: 1>, scalar_prefetch = 0 : i64, scratch_operands = 2 : i64, tpu.core_type = #tpu.core_type<tc>, window_params = [{transform_indices = @transform_0, window_bounds = array<i64: 64, 32>}, {pipeline_mode = #tpu.pipeline_mode<synchronous>, transform_indices = @transform_1, window_bounds = array<i64: 5, 32, 84>}, {pipeline_mode = #tpu.pipeline_mode<synchronous>, transform_indices = @transform_2, window_bounds = array<i64: 5, 32, 84>}, {pipeline_mode = #tpu.pipeline_mode<synchronous>, transform_indices = @transform_3, window_bounds = array<i64: 1, 84>}, {pipeline_mode = #tpu.pipeline_mode<synchronous>, transform_indices = @transform_4, window_bounds = array<i64: 5, 84, 80>}, {pipeline_mode = #tpu.pipeline_mode<synchronous>, transform_indices = @transform_5, window_bounds = array<i64: 5, 84, 80>}, {pipeline_mode = #tpu.pipeline_mode<synchronous>, transform_indices = @transform_6, window_bounds = array<i64: 1, 80>}, {pipeline_mode = #tpu.pipeline_mode<synchronous>, transform_indices = @transform_7, window_bounds = array<i64: 5, 80, 120>}, {pipeline_mode = #tpu.pipeline_mode<synchronous>, transform_indices = @transform_8, window_bounds = array<i64: 1, 120>}, {pipeline_mode = #tpu.pipeline_mode<synchronous>, transform_indices = @transform_9, window_bounds = array<i64: 120, 84>}, {pipeline_mode = #tpu.pipeline_mode<synchronous>, transform_indices = @transform_10, window_bounds = array<i64: 1, 84>}, {pipeline_mode = #tpu.pipeline_mode<synchronous>, transform_indices = @transform_11, window_bounds = array<i64: 84, 128>}, {pipeline_mode = #tpu.pipeline_mode<synchronous>, transform_indices = @transform_12, window_bounds = array<i64: 1, 128>}, {transform_indices = @transform_13, window_bounds = array<i64: 2, 128>}]} {
    %c0 = arith.constant 0 : index
    %c0_0 = arith.constant 0 : index
    %0 = vector.load %arg1[%c0, %c0_0] : memref<64x32xf32, #tpu.memory_space<vmem>>, vector<60x32xf32>
    %c0_1 = arith.constant 0 : index
    %c0_2 = arith.constant 0 : index
    %c0_3 = arith.constant 0 : index
    %1 = vector.load %arg2[%c0_1, %c0_2, %c0_3] : memref<5x32x84xbf16, #tpu.memory_space<vmem>>, vector<1x32x84xbf16>
    %2 = vector.shape_cast %1 : vector<1x32x84xbf16> to vector<32x84xbf16>
    %3 = arith.truncf %0 : vector<60x32xf32> to vector<60x32xbf16>
    %cst = arith.constant dense<0.000000e+00> : vector<60x84xf32>
    %4 = tpu.matmul %3, %2, %cst {dimension_numbers = #tpu.dot_dimension_numbers<[1], [0], [0], [1], [0, 0, 1, 1], [], []>} : vector<60x32xbf16>, vector<32x84xbf16>, vector<60x84xf32> -> vector<60x84xf32>
    %c0_4 = arith.constant 0 : index
    %c0_5 = arith.constant 0 : index
    %c0_6 = arith.constant 0 : index
    %5 = vector.load %arg3[%c0_4, %c0_5, %c0_6] : memref<5x32x84xbf16, #tpu.memory_space<vmem>>, vector<1x32x84xbf16>
    %6 = vector.shape_cast %5 : vector<1x32x84xbf16> to vector<32x84xbf16>
    %7 = arith.truncf %0 : vector<60x32xf32> to vector<60x32xbf16>
    %cst_7 = arith.constant dense<0.000000e+00> : vector<60x84xf32>
    %8 = tpu.matmul %7, %6, %cst_7 {dimension_numbers = #tpu.dot_dimension_numbers<[1], [0], [0], [1], [0, 0, 1, 1], [], []>} : vector<60x32xbf16>, vector<32x84xbf16>, vector<60x84xf32> -> vector<60x84xf32>
    %c1 = arith.constant 1 : index
    %c0_8 = arith.constant 0 : index
    %9 = vector.load %arg1[%c1, %c0_8] : memref<64x32xf32, #tpu.memory_space<vmem>>, vector<60x32xf32>
    %c1_9 = arith.constant 1 : index
    %c0_10 = arith.constant 0 : index
    %c0_11 = arith.constant 0 : index
    %10 = vector.load %arg2[%c1_9, %c0_10, %c0_11] : memref<5x32x84xbf16, #tpu.memory_space<vmem>>, vector<1x32x84xbf16>
    %11 = vector.shape_cast %10 : vector<1x32x84xbf16> to vector<32x84xbf16>
    %12 = arith.truncf %9 : vector<60x32xf32> to vector<60x32xbf16>
    %cst_12 = arith.constant dense<0.000000e+00> : vector<60x84xf32>
    %13 = tpu.matmul %12, %11, %cst_12 {dimension_numbers = #tpu.dot_dimension_numbers<[1], [0], [0], [1], [0, 0, 1, 1], [], []>} : vector<60x32xbf16>, vector<32x84xbf16>, vector<60x84xf32> -> vector<60x84xf32>
    %14 = arith.addf %4, %13 : vector<60x84xf32>
    %c1_13 = arith.constant 1 : index
    %c0_14 = arith.constant 0 : index
    %c0_15 = arith.constant 0 : index
    %15 = vector.load %arg3[%c1_13, %c0_14, %c0_15] : memref<5x32x84xbf16, #tpu.memory_space<vmem>>, vector<1x32x84xbf16>
    %16 = vector.shape_cast %15 : vector<1x32x84xbf16> to vector<32x84xbf16>
    %17 = arith.truncf %9 : vector<60x32xf32> to vector<60x32xbf16>
    %cst_16 = arith.constant dense<0.000000e+00> : vector<60x84xf32>
    %18 = tpu.matmul %17, %16, %cst_16 {dimension_numbers = #tpu.dot_dimension_numbers<[1], [0], [0], [1], [0, 0, 1, 1], [], []>} : vector<60x32xbf16>, vector<32x84xbf16>, vector<60x84xf32> -> vector<60x84xf32>
    %19 = arith.addf %8, %18 : vector<60x84xf32>
    %c2 = arith.constant 2 : index
    %c0_17 = arith.constant 0 : index
    %20 = vector.load %arg1[%c2, %c0_17] : memref<64x32xf32, #tpu.memory_space<vmem>>, vector<60x32xf32>
    %c2_18 = arith.constant 2 : index
    %c0_19 = arith.constant 0 : index
    %c0_20 = arith.constant 0 : index
    %21 = vector.load %arg2[%c2_18, %c0_19, %c0_20] : memref<5x32x84xbf16, #tpu.memory_space<vmem>>, vector<1x32x84xbf16>
    %22 = vector.shape_cast %21 : vector<1x32x84xbf16> to vector<32x84xbf16>
    %23 = arith.truncf %20 : vector<60x32xf32> to vector<60x32xbf16>
    %cst_21 = arith.constant dense<0.000000e+00> : vector<60x84xf32>
    %24 = tpu.matmul %23, %22, %cst_21 {dimension_numbers = #tpu.dot_dimension_numbers<[1], [0], [0], [1], [0, 0, 1, 1], [], []>} : vector<60x32xbf16>, vector<32x84xbf16>, vector<60x84xf32> -> vector<60x84xf32>
    %25 = arith.addf %14, %24 : vector<60x84xf32>
    %c2_22 = arith.constant 2 : index
    %c0_23 = arith.constant 0 : index
    %c0_24 = arith.constant 0 : index
    %26 = vector.load %arg3[%c2_22, %c0_23, %c0_24] : memref<5x32x84xbf16, #tpu.memory_space<vmem>>, vector<1x32x84xbf16>
    %27 = vector.shape_cast %26 : vector<1x32x84xbf16> to vector<32x84xbf16>
    %28 = arith.truncf %20 : vector<60x32xf32> to vector<60x32xbf16>
    %cst_25 = arith.constant dense<0.000000e+00> : vector<60x84xf32>
    %29 = tpu.matmul %28, %27, %cst_25 {dimension_numbers = #tpu.dot_dimension_numbers<[1], [0], [0], [1], [0, 0, 1, 1], [], []>} : vector<60x32xbf16>, vector<32x84xbf16>, vector<60x84xf32> -> vector<60x84xf32>
    %30 = arith.addf %19, %29 : vector<60x84xf32>
    %c3 = arith.constant 3 : index
    %c0_26 = arith.constant 0 : index
    %31 = vector.load %arg1[%c3, %c0_26] : memref<64x32xf32, #tpu.memory_space<vmem>>, vector<60x32xf32>
    %c3_27 = arith.constant 3 : index
    %c0_28 = arith.constant 0 : index
    %c0_29 = arith.constant 0 : index
    %32 = vector.load %arg2[%c3_27, %c0_28, %c0_29] : memref<5x32x84xbf16, #tpu.memory_space<vmem>>, vector<1x32x84xbf16>
    %33 = vector.shape_cast %32 : vector<1x32x84xbf16> to vector<32x84xbf16>
    %34 = arith.truncf %31 : vector<60x32xf32> to vector<60x32xbf16>
    %cst_30 = arith.constant dense<0.000000e+00> : vector<60x84xf32>
    %35 = tpu.matmul %34, %33, %cst_30 {dimension_numbers = #tpu.dot_dimension_numbers<[1], [0], [0], [1], [0, 0, 1, 1], [], []>} : vector<60x32xbf16>, vector<32x84xbf16>, vector<60x84xf32> -> vector<60x84xf32>
    %36 = arith.addf %25, %35 : vector<60x84xf32>
    %c3_31 = arith.constant 3 : index
    %c0_32 = arith.constant 0 : index
    %c0_33 = arith.constant 0 : index
    %37 = vector.load %arg3[%c3_31, %c0_32, %c0_33] : memref<5x32x84xbf16, #tpu.memory_space<vmem>>, vector<1x32x84xbf16>
    %38 = vector.shape_cast %37 : vector<1x32x84xbf16> to vector<32x84xbf16>
    %39 = arith.truncf %31 : vector<60x32xf32> to vector<60x32xbf16>
    %cst_34 = arith.constant dense<0.000000e+00> : vector<60x84xf32>
    %40 = tpu.matmul %39, %38, %cst_34 {dimension_numbers = #tpu.dot_dimension_numbers<[1], [0], [0], [1], [0, 0, 1, 1], [], []>} : vector<60x32xbf16>, vector<32x84xbf16>, vector<60x84xf32> -> vector<60x84xf32>
    %41 = arith.addf %30, %40 : vector<60x84xf32>
    %c4 = arith.constant 4 : index
    %c0_35 = arith.constant 0 : index
    %42 = vector.load %arg1[%c4, %c0_35] : memref<64x32xf32, #tpu.memory_space<vmem>>, vector<60x32xf32>
    %c4_36 = arith.constant 4 : index
    %c0_37 = arith.constant 0 : index
    %c0_38 = arith.constant 0 : index
    %43 = vector.load %arg2[%c4_36, %c0_37, %c0_38] : memref<5x32x84xbf16, #tpu.memory_space<vmem>>, vector<1x32x84xbf16>
    %44 = vector.shape_cast %43 : vector<1x32x84xbf16> to vector<32x84xbf16>
    %45 = arith.truncf %42 : vector<60x32xf32> to vector<60x32xbf16>
    %cst_39 = arith.constant dense<0.000000e+00> : vector<60x84xf32>
    %46 = tpu.matmul %45, %44, %cst_39 {dimension_numbers = #tpu.dot_dimension_numbers<[1], [0], [0], [1], [0, 0, 1, 1], [], []>} : vector<60x32xbf16>, vector<32x84xbf16>, vector<60x84xf32> -> vector<60x84xf32>
    %47 = arith.addf %36, %46 : vector<60x84xf32>
    %c4_40 = arith.constant 4 : index
    %c0_41 = arith.constant 0 : index
    %c0_42 = arith.constant 0 : index
    %48 = vector.load %arg3[%c4_40, %c0_41, %c0_42] : memref<5x32x84xbf16, #tpu.memory_space<vmem>>, vector<1x32x84xbf16>
    %49 = vector.shape_cast %48 : vector<1x32x84xbf16> to vector<32x84xbf16>
    %50 = arith.truncf %42 : vector<60x32xf32> to vector<60x32xbf16>
    %cst_43 = arith.constant dense<0.000000e+00> : vector<60x84xf32>
    %51 = tpu.matmul %50, %49, %cst_43 {dimension_numbers = #tpu.dot_dimension_numbers<[1], [0], [0], [1], [0, 0, 1, 1], [], []>} : vector<60x32xbf16>, vector<32x84xbf16>, vector<60x84xf32> -> vector<60x84xf32>
    %52 = arith.addf %41, %51 : vector<60x84xf32>
    %53 = arith.maximumf %47, %52 : vector<60x84xf32>
    %c0_44 = arith.constant 0 : index
    %c0_45 = arith.constant 0 : index
    %54 = vector.load %arg4[%c0_44, %c0_45] : memref<1x84xf32, #tpu.memory_space<vmem>>, vector<1x84xf32>
    %55 = vector.broadcast %54 : vector<1x84xf32> to vector<60x84xf32>
    %56 = arith.addf %53, %55 : vector<60x84xf32>
    %cst_46 = arith.constant 0.000000e+00 : f32
    %57 = vector.broadcast %cst_46 : f32 to vector<60x84xf32>
    %58 = arith.maximumf %56, %57 : vector<60x84xf32>
    %c0_47 = arith.constant 0 : index
    %c0_48 = arith.constant 0 : index
    %59 = vector.load %arg15[%c0_47, %c0_48] : memref<64x84xf32, #tpu.memory_space<vmem>>, vector<60x84xf32>
    tpu.vector_store %arg15[%c0_47, %c0_48], %58 {strides = array<i32>} : memref<64x84xf32, #tpu.memory_space<vmem>>, vector<60x84xf32>,
    %cst_49 = arith.constant 0.000000e+00 : f32
    %60 = vector.broadcast %cst_49 : f32 to vector<4x84xf32>
    %c60 = arith.constant 60 : index
    %c0_50 = arith.constant 0 : index
    %61 = vector.load %arg15[%c60, %c0_50] : memref<64x84xf32, #tpu.memory_space<vmem>>, vector<4x84xf32>
    tpu.vector_store %arg15[%c60, %c0_50], %60 {strides = array<i32>} : memref<64x84xf32, #tpu.memory_space<vmem>>, vector<4x84xf32>,
    %c0_51 = arith.constant 0 : index
    %c0_52 = arith.constant 0 : index
    %62 = tpu.strided_load %arg15[%c0_51, %c0_52] {strides = array<i32: 2, 1>} : memref<64x84xf32, #tpu.memory_space<vmem>>, vector<28x84xf32>
    %c1_53 = arith.constant 1 : index
    %c0_54 = arith.constant 0 : index
    %63 = tpu.strided_load %arg15[%c1_53, %c0_54] {strides = array<i32: 2, 1>} : memref<64x84xf32, #tpu.memory_space<vmem>>, vector<28x84xf32>
    %64 = arith.maximumf %62, %63 : vector<28x84xf32>
    %c0_55 = arith.constant 0 : index
    %c0_56 = arith.constant 0 : index
    %c0_57 = arith.constant 0 : index
    %65 = vector.load %arg5[%c0_55, %c0_56, %c0_57] : memref<5x84x80xbf16, #tpu.memory_space<vmem>>, vector<1x84x80xbf16>
    %66 = vector.shape_cast %65 : vector<1x84x80xbf16> to vector<84x80xbf16>
    %67 = arith.truncf %64 : vector<28x84xf32> to vector<28x84xbf16>
    %cst_58 = arith.constant dense<0.000000e+00> : vector<28x80xf32>
    %68 = tpu.matmul %67, %66, %cst_58 {dimension_numbers = #tpu.dot_dimension_numbers<[1], [0], [0], [1], [0, 0, 1, 1], [], []>} : vector<28x84xbf16>, vector<84x80xbf16>, vector<28x80xf32> -> vector<28x80xf32>
    %c0_59 = arith.constant 0 : index
    %c0_60 = arith.constant 0 : index
    %c0_61 = arith.constant 0 : index
    %69 = vector.load %arg6[%c0_59, %c0_60, %c0_61] : memref<5x84x80xbf16, #tpu.memory_space<vmem>>, vector<1x84x80xbf16>
    %70 = vector.shape_cast %69 : vector<1x84x80xbf16> to vector<84x80xbf16>
    %71 = arith.truncf %64 : vector<28x84xf32> to vector<28x84xbf16>
    %cst_62 = arith.constant dense<0.000000e+00> : vector<28x80xf32>
    %72 = tpu.matmul %71, %70, %cst_62 {dimension_numbers = #tpu.dot_dimension_numbers<[1], [0], [0], [1], [0, 0, 1, 1], [], []>} : vector<28x84xbf16>, vector<84x80xbf16>, vector<28x80xf32> -> vector<28x80xf32>
    %c2_63 = arith.constant 2 : index
    %c0_64 = arith.constant 0 : index
    %73 = tpu.strided_load %arg15[%c2_63, %c0_64] {strides = array<i32: 2, 1>} : memref<64x84xf32, #tpu.memory_space<vmem>>, vector<28x84xf32>
    %c3_65 = arith.constant 3 : index
    %c0_66 = arith.constant 0 : index
    %74 = tpu.strided_load %arg15[%c3_65, %c0_66] {strides = array<i32: 2, 1>} : memref<64x84xf32, #tpu.memory_space<vmem>>, vector<28x84xf32>
    %75 = arith.maximumf %73, %74 : vector<28x84xf32>
    %c1_67 = arith.constant 1 : index
    %c0_68 = arith.constant 0 : index
    %c0_69 = arith.constant 0 : index
    %76 = vector.load %arg5[%c1_67, %c0_68, %c0_69] : memref<5x84x80xbf16, #tpu.memory_space<vmem>>, vector<1x84x80xbf16>
    %77 = vector.shape_cast %76 : vector<1x84x80xbf16> to vector<84x80xbf16>
    %78 = arith.truncf %75 : vector<28x84xf32> to vector<28x84xbf16>
    %cst_70 = arith.constant dense<0.000000e+00> : vector<28x80xf32>
    %79 = tpu.matmul %78, %77, %cst_70 {dimension_numbers = #tpu.dot_dimension_numbers<[1], [0], [0], [1], [0, 0, 1, 1], [], []>} : vector<28x84xbf16>, vector<84x80xbf16>, vector<28x80xf32> -> vector<28x80xf32>
    %80 = arith.addf %68, %79 : vector<28x80xf32>
    %c1_71 = arith.constant 1 : index
    %c0_72 = arith.constant 0 : index
    %c0_73 = arith.constant 0 : index
    %81 = vector.load %arg6[%c1_71, %c0_72, %c0_73] : memref<5x84x80xbf16, #tpu.memory_space<vmem>>, vector<1x84x80xbf16>
    %82 = vector.shape_cast %81 : vector<1x84x80xbf16> to vector<84x80xbf16>
    %83 = arith.truncf %75 : vector<28x84xf32> to vector<28x84xbf16>
    %cst_74 = arith.constant dense<0.000000e+00> : vector<28x80xf32>
    %84 = tpu.matmul %83, %82, %cst_74 {dimension_numbers = #tpu.dot_dimension_numbers<[1], [0], [0], [1], [0, 0, 1, 1], [], []>} : vector<28x84xbf16>, vector<84x80xbf16>, vector<28x80xf32> -> vector<28x80xf32>
    %85 = arith.addf %72, %84 : vector<28x80xf32>
    %c4_75 = arith.constant 4 : index
    %c0_76 = arith.constant 0 : index
    %86 = tpu.strided_load %arg15[%c4_75, %c0_76] {strides = array<i32: 2, 1>} : memref<64x84xf32, #tpu.memory_space<vmem>>, vector<28x84xf32>
    %c5 = arith.constant 5 : index
    %c0_77 = arith.constant 0 : index
    %87 = tpu.strided_load %arg15[%c5, %c0_77] {strides = array<i32: 2, 1>} : memref<64x84xf32, #tpu.memory_space<vmem>>, vector<28x84xf32>
    %88 = arith.maximumf %86, %87 : vector<28x84xf32>
    %c2_78 = arith.constant 2 : index
    %c0_79 = arith.constant 0 : index
    %c0_80 = arith.constant 0 : index
    %89 = vector.load %arg5[%c2_78, %c0_79, %c0_80] : memref<5x84x80xbf16, #tpu.memory_space<vmem>>, vector<1x84x80xbf16>
    %90 = vector.shape_cast %89 : vector<1x84x80xbf16> to vector<84x80xbf16>
    %91 = arith.truncf %88 : vector<28x84xf32> to vector<28x84xbf16>
    %cst_81 = arith.constant dense<0.000000e+00> : vector<28x80xf32>
    %92 = tpu.matmul %91, %90, %cst_81 {dimension_numbers = #tpu.dot_dimension_numbers<[1], [0], [0], [1], [0, 0, 1, 1], [], []>} : vector<28x84xbf16>, vector<84x80xbf16>, vector<28x80xf32> -> vector<28x80xf32>
    %93 = arith.addf %80, %92 : vector<28x80xf32>
    %c2_82 = arith.constant 2 : index
    %c0_83 = arith.constant 0 : index
    %c0_84 = arith.constant 0 : index
    %94 = vector.load %arg6[%c2_82, %c0_83, %c0_84] : memref<5x84x80xbf16, #tpu.memory_space<vmem>>, vector<1x84x80xbf16>
    %95 = vector.shape_cast %94 : vector<1x84x80xbf16> to vector<84x80xbf16>
    %96 = arith.truncf %88 : vector<28x84xf32> to vector<28x84xbf16>
    %cst_85 = arith.constant dense<0.000000e+00> : vector<28x80xf32>
    %97 = tpu.matmul %96, %95, %cst_85 {dimension_numbers = #tpu.dot_dimension_numbers<[1], [0], [0], [1], [0, 0, 1, 1], [], []>} : vector<28x84xbf16>, vector<84x80xbf16>, vector<28x80xf32> -> vector<28x80xf32>
    %98 = arith.addf %85, %97 : vector<28x80xf32>
    %c6 = arith.constant 6 : index
    %c0_86 = arith.constant 0 : index
    %99 = tpu.strided_load %arg15[%c6, %c0_86] {strides = array<i32: 2, 1>} : memref<64x84xf32, #tpu.memory_space<vmem>>, vector<28x84xf32>
    %c7 = arith.constant 7 : index
    %c0_87 = arith.constant 0 : index
    %100 = tpu.strided_load %arg15[%c7, %c0_87] {strides = array<i32: 2, 1>} : memref<64x84xf32, #tpu.memory_space<vmem>>, vector<28x84xf32>
    %101 = arith.maximumf %99, %100 : vector<28x84xf32>
    %c3_88 = arith.constant 3 : index
    %c0_89 = arith.constant 0 : index
    %c0_90 = arith.constant 0 : index
    %102 = vector.load %arg5[%c3_88, %c0_89, %c0_90] : memref<5x84x80xbf16, #tpu.memory_space<vmem>>, vector<1x84x80xbf16>
    %103 = vector.shape_cast %102 : vector<1x84x80xbf16> to vector<84x80xbf16>
    %104 = arith.truncf %101 : vector<28x84xf32> to vector<28x84xbf16>
    %cst_91 = arith.constant dense<0.000000e+00> : vector<28x80xf32>
    %105 = tpu.matmul %104, %103, %cst_91 {dimension_numbers = #tpu.dot_dimension_numbers<[1], [0], [0], [1], [0, 0, 1, 1], [], []>} : vector<28x84xbf16>, vector<84x80xbf16>, vector<28x80xf32> -> vector<28x80xf32>
    %106 = arith.addf %93, %105 : vector<28x80xf32>
    %c3_92 = arith.constant 3 : index
    %c0_93 = arith.constant 0 : index
    %c0_94 = arith.constant 0 : index
    %107 = vector.load %arg6[%c3_92, %c0_93, %c0_94] : memref<5x84x80xbf16, #tpu.memory_space<vmem>>, vector<1x84x80xbf16>
    %108 = vector.shape_cast %107 : vector<1x84x80xbf16> to vector<84x80xbf16>
    %109 = arith.truncf %101 : vector<28x84xf32> to vector<28x84xbf16>
    %cst_95 = arith.constant dense<0.000000e+00> : vector<28x80xf32>
    %110 = tpu.matmul %109, %108, %cst_95 {dimension_numbers = #tpu.dot_dimension_numbers<[1], [0], [0], [1], [0, 0, 1, 1], [], []>} : vector<28x84xbf16>, vector<84x80xbf16>, vector<28x80xf32> -> vector<28x80xf32>
    %111 = arith.addf %98, %110 : vector<28x80xf32>
    %c8 = arith.constant 8 : index
    %c0_96 = arith.constant 0 : index
    %112 = tpu.strided_load %arg15[%c8, %c0_96] {strides = array<i32: 2, 1>} : memref<64x84xf32, #tpu.memory_space<vmem>>, vector<28x84xf32>
    %c9 = arith.constant 9 : index
    %c0_97 = arith.constant 0 : index
    %113 = tpu.strided_load %arg15[%c9, %c0_97] {strides = array<i32: 2, 1>} : memref<64x84xf32, #tpu.memory_space<vmem>>, vector<28x84xf32>
    %114 = arith.maximumf %112, %113 : vector<28x84xf32>
    %c4_98 = arith.constant 4 : index
    %c0_99 = arith.constant 0 : index
    %c0_100 = arith.constant 0 : index
    %115 = vector.load %arg5[%c4_98, %c0_99, %c0_100] : memref<5x84x80xbf16, #tpu.memory_space<vmem>>, vector<1x84x80xbf16>
    %116 = vector.shape_cast %115 : vector<1x84x80xbf16> to vector<84x80xbf16>
    %117 = arith.truncf %114 : vector<28x84xf32> to vector<28x84xbf16>
    %cst_101 = arith.constant dense<0.000000e+00> : vector<28x80xf32>
    %118 = tpu.matmul %117, %116, %cst_101 {dimension_numbers = #tpu.dot_dimension_numbers<[1], [0], [0], [1], [0, 0, 1, 1], [], []>} : vector<28x84xbf16>, vector<84x80xbf16>, vector<28x80xf32> -> vector<28x80xf32>
    %119 = arith.addf %106, %118 : vector<28x80xf32>
    %c4_102 = arith.constant 4 : index
    %c0_103 = arith.constant 0 : index
    %c0_104 = arith.constant 0 : index
    %120 = vector.load %arg6[%c4_102, %c0_103, %c0_104] : memref<5x84x80xbf16, #tpu.memory_space<vmem>>, vector<1x84x80xbf16>
    %121 = vector.shape_cast %120 : vector<1x84x80xbf16> to vector<84x80xbf16>
    %122 = arith.truncf %114 : vector<28x84xf32> to vector<28x84xbf16>
    %cst_105 = arith.constant dense<0.000000e+00> : vector<28x80xf32>
    %123 = tpu.matmul %122, %121, %cst_105 {dimension_numbers = #tpu.dot_dimension_numbers<[1], [0], [0], [1], [0, 0, 1, 1], [], []>} : vector<28x84xbf16>, vector<84x80xbf16>, vector<28x80xf32> -> vector<28x80xf32>
    %124 = arith.addf %111, %123 : vector<28x80xf32>
    %125 = arith.maximumf %119, %124 : vector<28x80xf32>
    %c0_106 = arith.constant 0 : index
    %c0_107 = arith.constant 0 : index
    %126 = vector.load %arg7[%c0_106, %c0_107] : memref<1x80xf32, #tpu.memory_space<vmem>>, vector<1x80xf32>
    %127 = vector.broadcast %126 : vector<1x80xf32> to vector<28x80xf32>
    %128 = arith.addf %125, %127 : vector<28x80xf32>
    %cst_108 = arith.constant 0.000000e+00 : f32
    %129 = vector.broadcast %cst_108 : f32 to vector<28x80xf32>
    %130 = arith.maximumf %128, %129 : vector<28x80xf32>
    %c0_109 = arith.constant 0 : index
    %c0_110 = arith.constant 0 : index
    %131 = vector.load %arg16[%c0_109, %c0_110] : memref<32x80xf32, #tpu.memory_space<vmem>>, vector<28x80xf32>
    tpu.vector_store %arg16[%c0_109, %c0_110], %130 {strides = array<i32>} : memref<32x80xf32, #tpu.memory_space<vmem>>, vector<28x80xf32>,
    %cst_111 = arith.constant 0.000000e+00 : f32
    %132 = vector.broadcast %cst_111 : f32 to vector<4x80xf32>
    %c28 = arith.constant 28 : index
    %c0_112 = arith.constant 0 : index
    %133 = vector.load %arg16[%c28, %c0_112] : memref<32x80xf32, #tpu.memory_space<vmem>>, vector<4x80xf32>
    tpu.vector_store %arg16[%c28, %c0_112], %132 {strides = array<i32>} : memref<32x80xf32, #tpu.memory_space<vmem>>, vector<4x80xf32>,
    %c0_113 = arith.constant 0 : index
    %c0_114 = arith.constant 0 : index
    %134 = tpu.strided_load %arg16[%c0_113, %c0_114] {strides = array<i32: 16, 1>} : memref<32x80xf32, #tpu.memory_space<vmem>>, vector<2x80xf32>
    %c1_115 = arith.constant 1 : index
    %c0_116 = arith.constant 0 : index
    %135 = tpu.strided_load %arg16[%c1_115, %c0_116] {strides = array<i32: 16, 1>} : memref<32x80xf32, #tpu.memory_space<vmem>>, vector<2x80xf32>
    %136 = arith.maximumf %134, %135 : vector<2x80xf32>
    %c0_117 = arith.constant 0 : index
    %c0_118 = arith.constant 0 : index
    %c0_119 = arith.constant 0 : index
    %137 = vector.load %arg8[%c0_117, %c0_118, %c0_119] : memref<5x80x120xbf16, #tpu.memory_space<vmem>>, vector<1x80x120xbf16>
    %138 = vector.shape_cast %137 : vector<1x80x120xbf16> to vector<80x120xbf16>
    %139 = arith.truncf %136 : vector<2x80xf32> to vector<2x80xbf16>
    %cst_120 = arith.constant dense<0.000000e+00> : vector<2x120xf32>
    %140 = tpu.matmul %139, %138, %cst_120 {dimension_numbers = #tpu.dot_dimension_numbers<[1], [0], [0], [1], [0, 0, 1, 1], [], []>} : vector<2x80xbf16>, vector<80x120xbf16>, vector<2x120xf32> -> vector<2x120xf32>
    %c2_121 = arith.constant 2 : index
    %c0_122 = arith.constant 0 : index
    %141 = tpu.strided_load %arg16[%c2_121, %c0_122] {strides = array<i32: 16, 1>} : memref<32x80xf32, #tpu.memory_space<vmem>>, vector<2x80xf32>
    %c3_123 = arith.constant 3 : index
    %c0_124 = arith.constant 0 : index
    %142 = tpu.strided_load %arg16[%c3_123, %c0_124] {strides = array<i32: 16, 1>} : memref<32x80xf32, #tpu.memory_space<vmem>>, vector<2x80xf32>
    %143 = arith.maximumf %141, %142 : vector<2x80xf32>
    %c1_125 = arith.constant 1 : index
    %c0_126 = arith.constant 0 : index
    %c0_127 = arith.constant 0 : index
    %144 = vector.load %arg8[%c1_125, %c0_126, %c0_127] : memref<5x80x120xbf16, #tpu.memory_space<vmem>>, vector<1x80x120xbf16>
    %145 = vector.shape_cast %144 : vector<1x80x120xbf16> to vector<80x120xbf16>
    %146 = arith.truncf %143 : vector<2x80xf32> to vector<2x80xbf16>
    %cst_128 = arith.constant dense<0.000000e+00> : vector<2x120xf32>
    %147 = tpu.matmul %146, %145, %cst_128 {dimension_numbers = #tpu.dot_dimension_numbers<[1], [0], [0], [1], [0, 0, 1, 1], [], []>} : vector<2x80xbf16>, vector<80x120xbf16>, vector<2x120xf32> -> vector<2x120xf32>
    %148 = arith.addf %140, %147 : vector<2x120xf32>
    %c4_129 = arith.constant 4 : index
    %c0_130 = arith.constant 0 : index
    %149 = tpu.strided_load %arg16[%c4_129, %c0_130] {strides = array<i32: 16, 1>} : memref<32x80xf32, #tpu.memory_space<vmem>>, vector<2x80xf32>
    %c5_131 = arith.constant 5 : index
    %c0_132 = arith.constant 0 : index
    %150 = tpu.strided_load %arg16[%c5_131, %c0_132] {strides = array<i32: 16, 1>} : memref<32x80xf32, #tpu.memory_space<vmem>>, vector<2x80xf32>
    %151 = arith.maximumf %149, %150 : vector<2x80xf32>
    %c2_133 = arith.constant 2 : index
    %c0_134 = arith.constant 0 : index
    %c0_135 = arith.constant 0 : index
    %152 = vector.load %arg8[%c2_133, %c0_134, %c0_135] : memref<5x80x120xbf16, #tpu.memory_space<vmem>>, vector<1x80x120xbf16>
    %153 = vector.shape_cast %152 : vector<1x80x120xbf16> to vector<80x120xbf16>
    %154 = arith.truncf %151 : vector<2x80xf32> to vector<2x80xbf16>
    %cst_136 = arith.constant dense<0.000000e+00> : vector<2x120xf32>
    %155 = tpu.matmul %154, %153, %cst_136 {dimension_numbers = #tpu.dot_dimension_numbers<[1], [0], [0], [1], [0, 0, 1, 1], [], []>} : vector<2x80xbf16>, vector<80x120xbf16>, vector<2x120xf32> -> vector<2x120xf32>
    %156 = arith.addf %148, %155 : vector<2x120xf32>
    %c6_137 = arith.constant 6 : index
    %c0_138 = arith.constant 0 : index
    %157 = tpu.strided_load %arg16[%c6_137, %c0_138] {strides = array<i32: 16, 1>} : memref<32x80xf32, #tpu.memory_space<vmem>>, vector<2x80xf32>
    %c7_139 = arith.constant 7 : index
    %c0_140 = arith.constant 0 : index
    %158 = tpu.strided_load %arg16[%c7_139, %c0_140] {strides = array<i32: 16, 1>} : memref<32x80xf32, #tpu.memory_space<vmem>>, vector<2x80xf32>
    %159 = arith.maximumf %157, %158 : vector<2x80xf32>
    %c3_141 = arith.constant 3 : index
    %c0_142 = arith.constant 0 : index
    %c0_143 = arith.constant 0 : index
    %160 = vector.load %arg8[%c3_141, %c0_142, %c0_143] : memref<5x80x120xbf16, #tpu.memory_space<vmem>>, vector<1x80x120xbf16>
    %161 = vector.shape_cast %160 : vector<1x80x120xbf16> to vector<80x120xbf16>
    %162 = arith.truncf %159 : vector<2x80xf32> to vector<2x80xbf16>
    %cst_144 = arith.constant dense<0.000000e+00> : vector<2x120xf32>
    %163 = tpu.matmul %162, %161, %cst_144 {dimension_numbers = #tpu.dot_dimension_numbers<[1], [0], [0], [1], [0, 0, 1, 1], [], []>} : vector<2x80xbf16>, vector<80x120xbf16>, vector<2x120xf32> -> vector<2x120xf32>
    %164 = arith.addf %156, %163 : vector<2x120xf32>
    %c8_145 = arith.constant 8 : index
    %c0_146 = arith.constant 0 : index
    %165 = tpu.strided_load %arg16[%c8_145, %c0_146] {strides = array<i32: 16, 1>} : memref<32x80xf32, #tpu.memory_space<vmem>>, vector<2x80xf32>
    %c9_147 = arith.constant 9 : index
    %c0_148 = arith.constant 0 : index
    %166 = tpu.strided_load %arg16[%c9_147, %c0_148] {strides = array<i32: 16, 1>} : memref<32x80xf32, #tpu.memory_space<vmem>>, vector<2x80xf32>
    %167 = arith.maximumf %165, %166 : vector<2x80xf32>
    %c4_149 = arith.constant 4 : index
    %c0_150 = arith.constant 0 : index
    %c0_151 = arith.constant 0 : index
    %168 = vector.load %arg8[%c4_149, %c0_150, %c0_151] : memref<5x80x120xbf16, #tpu.memory_space<vmem>>, vector<1x80x120xbf16>
    %169 = vector.shape_cast %168 : vector<1x80x120xbf16> to vector<80x120xbf16>
    %170 = arith.truncf %167 : vector<2x80xf32> to vector<2x80xbf16>
    %cst_152 = arith.constant dense<0.000000e+00> : vector<2x120xf32>
    %171 = tpu.matmul %170, %169, %cst_152 {dimension_numbers = #tpu.dot_dimension_numbers<[1], [0], [0], [1], [0, 0, 1, 1], [], []>} : vector<2x80xbf16>, vector<80x120xbf16>, vector<2x120xf32> -> vector<2x120xf32>
    %172 = arith.addf %164, %171 : vector<2x120xf32>
    %c0_153 = arith.constant 0 : index
    %c0_154 = arith.constant 0 : index
    %173 = vector.load %arg9[%c0_153, %c0_154] : memref<1x120xf32, #tpu.memory_space<vmem>>, vector<1x120xf32>
    %174 = vector.broadcast %173 : vector<1x120xf32> to vector<2x120xf32>
    %175 = arith.addf %172, %174 : vector<2x120xf32>
    %cst_155 = arith.constant 0.000000e+00 : f32
    %176 = vector.broadcast %cst_155 : f32 to vector<2x120xf32>
    %177 = arith.maximumf %175, %176 : vector<2x120xf32>
    %c0_156 = arith.constant 0 : index
    %c0_157 = arith.constant 0 : index
    %178 = vector.load %arg10[%c0_156, %c0_157] : memref<120x84xbf16, #tpu.memory_space<vmem>>, vector<120x84xbf16>
    %179 = arith.truncf %177 : vector<2x120xf32> to vector<2x120xbf16>
    %cst_158 = arith.constant dense<0.000000e+00> : vector<2x84xf32>
    %180 = tpu.matmul %179, %178, %cst_158 {dimension_numbers = #tpu.dot_dimension_numbers<[1], [0], [0], [1], [0, 0, 1, 1], [], []>} : vector<2x120xbf16>, vector<120x84xbf16>, vector<2x84xf32> -> vector<2x84xf32>
    %c0_159 = arith.constant 0 : index
    %c0_160 = arith.constant 0 : index
    %181 = vector.load %arg11[%c0_159, %c0_160] : memref<1x84xf32, #tpu.memory_space<vmem>>, vector<1x84xf32>
    %182 = vector.broadcast %181 : vector<1x84xf32> to vector<2x84xf32>
    %183 = arith.addf %180, %182 : vector<2x84xf32>
    %cst_161 = arith.constant 0.000000e+00 : f32
    %184 = vector.broadcast %cst_161 : f32 to vector<2x84xf32>
    %185 = arith.maximumf %183, %184 : vector<2x84xf32>
    %c0_162 = arith.constant 0 : index
    %c0_163 = arith.constant 0 : index
    %186 = vector.load %arg12[%c0_162, %c0_163] : memref<84x128xbf16, #tpu.memory_space<vmem>>, vector<84x128xbf16>
    %187 = arith.truncf %185 : vector<2x84xf32> to vector<2x84xbf16>
    %cst_164 = arith.constant dense<0.000000e+00> : vector<2x128xf32>
    %188 = tpu.matmul %187, %186, %cst_164 {dimension_numbers = #tpu.dot_dimension_numbers<[1], [0], [0], [1], [0, 0, 1, 1], [], []>} : vector<2x84xbf16>, vector<84x128xbf16>, vector<2x128xf32> -> vector<2x128xf32>
    %c0_165 = arith.constant 0 : index
    %c0_166 = arith.constant 0 : index
    %189 = vector.load %arg13[%c0_165, %c0_166] : memref<1x128xf32, #tpu.memory_space<vmem>>, vector<1x128xf32>
    %190 = vector.broadcast %189 : vector<1x128xf32> to vector<2x128xf32>
    %191 = arith.addf %188, %190 : vector<2x128xf32>
    %cst_167 = arith.constant dense<0xFF800000> : vector<2xf32>
    %192 = vector.multi_reduction <maximumf>, %191, %cst_167 [1] : vector<2x128xf32> to vector<2xf32>
    %193 = vector.shape_cast %192 : vector<2xf32> to vector<2x1xf32>
    %194 = vector.broadcast %193 : vector<2x1xf32> to vector<2x128xf32>
    %195 = arith.subf %191, %194 : vector<2x128xf32>
    %196 = math.exp %195 : vector<2x128xf32>
    %cst_168 = arith.constant dense<0.000000e+00> : vector<2xf32>
    %197 = vector.multi_reduction <add>, %196, %cst_168 [1] : vector<2x128xf32> to vector<2xf32>
    %198 = vector.shape_cast %197 : vector<2xf32> to vector<2x1xf32>
    %199 = vector.broadcast %198 : vector<2x1xf32> to vector<2x128xf32>
    %200 = arith.divf %196, %199 : vector<2x128xf32>
    %c0_169 = arith.constant 0 : index
    %c0_170 = arith.constant 0 : index
    %201 = vector.load %arg14[%c0_169, %c0_170] : memref<2x128xf32, #tpu.memory_space<vmem>>, vector<2x128xf32>
    tpu.vector_store %arg14[%c0_169, %c0_170], %200 {strides = array<i32>} : memref<2x128xf32, #tpu.memory_space<vmem>>, vector<2x128xf32>,
    return
  }
  func.func @transform_0(%arg0: i32) -> (i32, i32) {
    %c0_i32 = arith.constant 0 : i32
    %c0_i32_0 = arith.constant 0 : i32
    return %arg0, %c0_i32 : i32, i32
  }
  func.func @transform_1(%arg0: i32) -> (i32, i32, i32) {
    %c0_i32 = arith.constant 0 : i32
    %c0_i32_0 = arith.constant 0 : i32
    %c0_i32_1 = arith.constant 0 : i32
    %c0_i32_2 = arith.constant 0 : i32
    return %c0_i32, %c0_i32_0, %c0_i32_1 : i32, i32, i32
  }
  func.func @transform_2(%arg0: i32) -> (i32, i32, i32) {
    %c0_i32 = arith.constant 0 : i32
    %c0_i32_0 = arith.constant 0 : i32
    %c0_i32_1 = arith.constant 0 : i32
    %c0_i32_2 = arith.constant 0 : i32
    return %c0_i32, %c0_i32_0, %c0_i32_1 : i32, i32, i32
  }
  func.func @transform_3(%arg0: i32) -> (i32, i32) {
    %c0_i32 = arith.constant 0 : i32
    %c0_i32_0 = arith.constant 0 : i32
    %c0_i32_1 = arith.constant 0 : i32
    return %c0_i32, %c0_i32_0 : i32, i32
  }
  func.func @transform_4(%arg0: i32) -> (i32, i32, i32) {
    %c0_i32 = arith.constant 0 : i32
    %c0_i32_0 = arith.constant 0 : i32
    %c0_i32_1 = arith.constant 0 : i32
    %c0_i32_2 = arith.constant 0 : i32
    return %c0_i32, %c0_i32_0, %c0_i32_1 : i32, i32, i32
  }
  func.func @transform_5(%arg0: i32) -> (i32, i32, i32) {
    %c0_i32 = arith.constant 0 : i32
    %c0_i32_0 = arith.constant 0 : i32
    %c0_i32_1 = arith.constant 0 : i32
    %c0_i32_2 = arith.constant 0 : i32
    return %c0_i32, %c0_i32_0, %c0_i32_1 : i32, i32, i32
  }
  func.func @transform_6(%arg0: i32) -> (i32, i32) {
    %c0_i32 = arith.constant 0 : i32
    %c0_i32_0 = arith.constant 0 : i32
    %c0_i32_1 = arith.constant 0 : i32
    return %c0_i32, %c0_i32_0 : i32, i32
  }
  func.func @transform_7(%arg0: i32) -> (i32, i32, i32) {
    %c0_i32 = arith.constant 0 : i32
    %c0_i32_0 = arith.constant 0 : i32
    %c0_i32_1 = arith.constant 0 : i32
    %c0_i32_2 = arith.constant 0 : i32
    return %c0_i32, %c0_i32_0, %c0_i32_1 : i32, i32, i32
  }
  func.func @transform_8(%arg0: i32) -> (i32, i32) {
    %c0_i32 = arith.constant 0 : i32
    %c0_i32_0 = arith.constant 0 : i32
    %c0_i32_1 = arith.constant 0 : i32
    return %c0_i32, %c0_i32_0 : i32, i32
  }
  func.func @transform_9(%arg0: i32) -> (i32, i32) {
    %c0_i32 = arith.constant 0 : i32
    %c0_i32_0 = arith.constant 0 : i32
    %c0_i32_1 = arith.constant 0 : i32
    return %c0_i32, %c0_i32_0 : i32, i32
  }
  func.func @transform_10(%arg0: i32) -> (i32, i32) {
    %c0_i32 = arith.constant 0 : i32
    %c0_i32_0 = arith.constant 0 : i32
    %c0_i32_1 = arith.constant 0 : i32
    return %c0_i32, %c0_i32_0 : i32, i32
  }
  func.func @transform_11(%arg0: i32) -> (i32, i32) {
    %c0_i32 = arith.constant 0 : i32
    %c0_i32_0 = arith.constant 0 : i32
    %c0_i32_1 = arith.constant 0 : i32
    return %c0_i32, %c0_i32_0 : i32, i32
  }
  func.func @transform_12(%arg0: i32) -> (i32, i32) {
    %c0_i32 = arith.constant 0 : i32
    %c0_i32_0 = arith.constant 0 : i32
    %c0_i32_1 = arith.constant 0 : i32
    return %c0_i32, %c0_i32_0 : i32, i32
  }
  func.func @transform_13(%arg0: i32) -> (i32, i32) {
    %c0_i32 = arith.constant 0 : i32
    %c0_i32_0 = arith.constant 0 : i32
    return %arg0, %c0_i32 : i32, i32
  }
}

</mosaic_0001>

<bundles_post_ra>
// kernel: lenet_forward.1
= control target key start
LH: loop header
LB: loop body
LE: loop exit
PB: predicated region body
PF: predicated region fallthrough
CT: control target
= control target key end

     0   :  { %vm95_vm0 = vcmask 261120   ;;  %s4848_s0 = inlined_call_operand.vmem [shape: f32[64,32], index: 0, kind: input, shape index: {}]   ;;  %s4849_s1 = inlined_call_operand.vmem [shape: bf16[5,32,84], index: 1, kind: input, shape index: {}]   ;;  %s4850_s2 = inlined_call_operand.vmem [shape: bf16[5,32,84], index: 2, kind: input, shape index: {}]   ;;  %s4851_s3 = inlined_call_operand.vmem [shape: f32[1,84], index: 3, kind: input, shape index: {}]   ;;  %s4852_s4 = inlined_call_operand.vmem [shape: bf16[5,84,80], index: 4, kind: input, shape index: {}]   ;;  %s4853_s5 = inlined_call_operand.vmem [shape: bf16[5,84,80], index: 5, kind: input, shape index: {}]   ;;  %s4854_s6 = inlined_call_operand.vmem [shape: f32[1,80], index: 6, kind: input, shape index: {}]   ;;  %s4855_s7 = inlined_call_operand.vmem [shape: bf16[5,80,120], index: 7, kind: input, shape index: {}]   ;;  %s4856_s8 = inlined_call_operand.vmem [shape: f32[1,120], index: 8, kind: input, shape index: {}]   ;;  %s4857_s9 = inlined_call_operand.vmem [shape: bf16[120,84], index: 9, kind: input, shape index: {}]   ;;  %s4858_s10 = inlined_call_operand.vmem [shape: f32[1,84], index: 10, kind: input, shape index: {}]   ;;  %s4859_s11 = inlined_call_operand.vmem [shape: bf16[84,128], index: 11, kind: input, shape index: {}]   ;;  %s4860_s12 = inlined_call_operand.vmem [shape: f32[1,128], index: 12, kind: input, shape index: {}]   ;;  %s4861_s13 = inlined_call_operand.hbm [shape: f32[2,128], index: 13, kind: output, shape index: {}]  }
   0x1   :  { %v3874_v0 = vld [vmem:[%s4849_s1 + $0x18] sm:$0xff]   ;;  %v3875_v1 = vld [vmem:[%s4849_s1 + $0x10] sm:$0xff]   ;;  %v66_v2 = vld [vmem:[%s4848_s0 + $0x1] sm:$0xff] }
   0x2   :  { %3471 = vmatprep.subr.bf16.mxu0 %v3874_v0  ;;  %3857 = vmatprep.subr.bf16.mxu1 %v3874_v0  ;;  %v67_v3 = vld [vmem:[%s4848_s0 + $0x9] sm:$0xff]  ;;  %v70_v4 = vld [vmem:[%s4848_s0 + $0x21] sm:$0xff]  ;;  %v68_v7 = vld [vmem:[%s4848_s0 + $0x11] sm:$0xff] }
   0x3   :  { %3472 = vmatpush3.bf16.msra.mxu0 %v3874_v0  ;;  %3859 = vmatpush3.bf16.msra.mxu1 %v3874_v0  ;;  %v79_v5 = vpack.c.bf16 %v67_v3, %v66_v2  ;;  %v71_v6 = vld [vmem:[%s4848_s0 + $0x29] sm:$0xff]  ;;  %v69_v8 = vld [vmem:[%s4848_s0 + $0x19] sm:$0xff]  ;;  %v72_v10 = vld [vmem:[%s4848_s0 + $0x31] sm:$0xff] }
   0x4   :  { %3473 = vmatprep.subr.bf16.mxu0 %v3875_v1  ;;  %3858 = vmatprep.subr.bf16.mxu1 %v3875_v1  ;;  %v81_v9 = vpack.c.bf16 %v71_v6, %v70_v4  ;;  %v73_v11 = vld [vmem:[%s4848_s0 + $0x39] sm:$0xf]  ;;  %v3876_v12 = vld [vmem:[%s4849_s1 + $0x8] sm:$0xff]   ;;  %v80_v13 = vpack.c.bf16 %v69_v8, %v68_v7  ;;  %v3878_v16 = vld [vmem:[%s4849_s1] sm:$0xff]  }
   0x5   :  { %3475 = vmatprep.mubr.msk.bf16.mxu0 %vm95_vm0, %v79_v5  ;;  %v82_v14 = vpack.c.bf16 %v73_v11, %v72_v10  ;;  %v3877_v15 = vld [vmem:[%s4850_s2 + $0x18] sm:$0xff]   ;;  %v3879_v17 = vld [vmem:[%s4850_s2 + $0x10] sm:$0xff]   ;;  %v46_v18 = vld [vmem:[%s4848_s0] sm:$0xff] }
   0x6   :  { %3479 = vmatprep.mubr.msk.bf16.mxu1 %vm95_vm0, %v81_v9  ;;  %v47_v19 = vld [vmem:[%s4848_s0 + $0x8] sm:$0xff]  ;;  %v48_v21 = vld [vmem:[%s4848_s0 + $0x10] sm:$0xff]  ;;  %v49_v22 = vld [vmem:[%s4848_s0 + $0x18] sm:$0xff] }
   0x7   :  { %3474 = vmatpush3.bf16.msra.mxu0 %v3875_v1  ;;  %3860 = vmatpush3.bf16.msra.mxu1 %v3875_v1  ;;  %v58_v20 = vpack.c.bf16 %v47_v19, %v46_v18  ;;  %v3880_v23 = vld [vmem:[%s4850_s2 + $0x8] sm:$0xff]   ;;  %v50_v24 = vld [vmem:[%s4848_s0 + $0x20] sm:$0xff]  ;;  %v59_v26 = vpack.c.bf16 %v49_v22, %v48_v21  ;;  %v52_v30 = vld [vmem:[%s4848_s0 + $0x30] sm:$0xff] }
   0x8   :  { %3483 = vmatprep.subr.bf16.mxu1 %v3876_v12  ;;  %3495 = vmatprep.subr.bf16.mxu0 %v3877_v15  ;;  %v51_v25 = vld [vmem:[%s4848_s0 + $0x28] sm:$0xff]  ;;  %v3881_v29 = vld [vmem:[%s4850_s2] sm:$0xff]   ;;  %v53_v31 = vld [vmem:[%s4848_s0 + $0x38] sm:$0xf] }
   0x9   :  { %v3882_v27 = vld [vmem:[%s4849_s1 + $0x28] sm:$0xff]   ;;  %v60_v28 = vpack.c.bf16 %v51_v25, %v50_v24  ;;  %v3883_v32 = vld [vmem:[%s4849_s1 + $0x20] sm:$0xff]   ;;  %v61_v36 = vpack.c.bf16 %v53_v31, %v52_v30  ;;  %v3886_v38 = vld [vmem:[%s4849_s1 + $0x38] sm:$0xff]  }
   0xa   :  { %3476 = vmatmul.mubr.msk.bf16.vlgmr.msra.gmra.mxu0 %vm95_vm0, %v80_v13  ;;  %3480 = vmatmul.mubr.msk.bf16.vlgmr.msra.gmra.mxu1 %vm95_vm0, %v82_v14  ;;  %v421_v33 = vld [vmem:[%s4848_s0 + $0x2] sm:$0xff]  ;;  %v422_v34 = vld [vmem:[%s4848_s0 + $0xa] sm:$0xff]  ;;  %v423_v39 = vld [vmem:[%s4848_s0 + $0x12] sm:$0xff] }
   0xb   :  { %3484 = vmatpush3.bf16.msra.mxu1 %v3876_v12  ;;  %3496 = vmatpush3.bf16.msra.mxu0 %v3877_v15  ;;  %v3884_v35 = vld [vmem:[%s4850_s2 + $0x28] sm:$0xff]   ;;  %v434_v37 = vpack.c.bf16 %v422_v34, %v421_v33  ;;  %v424_v40 = vld [vmem:[%s4848_s0 + $0x1a] sm:$0xff]  ;;  %v427_v46 = vld [vmem:[%s4848_s0 + $0x32] sm:$0xff] }
   0xc   :  { %3485 = vmatprep.subr.bf16.mxu1 %v3878_v16  ;;  %3497 = vmatprep.subr.bf16.mxu0 %v3879_v17  ;;  %v425_v41 = vld [vmem:[%s4848_s0 + $0x22] sm:$0xff]  ;;  %v426_v42 = vld [vmem:[%s4848_s0 + $0x2a] sm:$0xff]  ;;  %v435_v43 = vpack.c.bf16 %v424_v40, %v423_v39  ;;  %v428_v47 = vld [vmem:[%s4848_s0 + $0x3a] sm:$0xf] }
   0xd   :  { %3487 = vmatprep.mubr.msk.bf16.mxu1 %vm95_vm0, %v58_v20  ;;  %3499 = vmatprep.mubr.msk.bf16.mxu0 %vm95_vm0, %v79_v5  ;;  %v436_v44 = vpack.c.bf16 %v426_v42, %v425_v41  ;;  %v3885_v45 = vld [vmem:[%s4850_s2 + $0x20] sm:$0xff]   ;;  %v3887_v48 = vld [vmem:[%s4849_s1 + $0x30] sm:$0xff]   ;;  %v3888_v51 = vld [vmem:[%s4850_s2 + $0x38] sm:$0xff]   ;;  %v437_v52 = vpack.c.bf16 %v428_v47, %v427_v46 }
   0xe   :  { %v625_v49 = vld [vmem:[%s4848_s0 + $0x3] sm:$0xff]  ;;  %v626_v50 = vld [vmem:[%s4848_s0 + $0xb] sm:$0xff]  ;;  %v627_v55 = vld [vmem:[%s4848_s0 + $0x13] sm:$0xff] }
   0xf   :  { %3486 = vmatpush3.bf16.msra.mxu1 %v3878_v16  ;;  %3498 = vmatpush3.bf16.msra.mxu0 %v3879_v17  ;;  %v3890_v53 = vld [vmem:[%s4849_s1 + $0x48] sm:$0xff]   ;;  %v638_v54 = vpack.c.bf16 %v626_v50, %v625_v49  ;;  %v628_v56 = vld [vmem:[%s4848_s0 + $0x1b] sm:$0xff]  ;;  %v3889_v60 = vld [vmem:[%s4850_s2 + $0x30] sm:$0xff]  }
  0x10   :  { %3507 = vmatprep.subr.bf16.mxu1 %v3880_v23  ;;  %3519 = vmatprep.subr.bf16.mxu0 %v3882_v27  ;;  %v629_v57 = vld [vmem:[%s4848_s0 + $0x23] sm:$0xff]  ;;  %v630_v58 = vld [vmem:[%s4848_s0 + $0x2b] sm:$0xff]  ;;  %v639_v59 = vpack.c.bf16 %v628_v56, %v627_v55  ;;  %v631_v63 = vld [vmem:[%s4848_s0 + $0x33] sm:$0xff] }
  0x11   :  { %v640_v61 = vpack.c.bf16 %v630_v58, %v629_v57  ;;  %v3891_v62 = vld [vmem:[%s4849_s1 + $0x40] sm:$0xff]   ;;  %v632_v0 = vld [vmem:[%s4848_s0 + $0x3b] sm:$0xf]  ;;  %v830_v2 = vld [vmem:[%s4848_s0 + $0xc] sm:$0xff] }
  0x12   :  { %3488 = vmatmul.mubr.msk.bf16.vlgmr.msra.gmra.mxu1 %vm95_vm0, %v59_v26  ;;  %3500 = vmatmul.mubr.msk.bf16.vlgmr.msra.gmra.mxu0 %vm95_vm0, %v80_v13  ;;  %v829_v1 = vld [vmem:[%s4848_s0 + $0x4] sm:$0xff]  ;;  %v641_v4 = vpack.c.bf16 %v632_v0, %v631_v63  ;;  %v831_v6 = vld [vmem:[%s4848_s0 + $0x14] sm:$0xff]  ;;  %v832_v7 = vld [vmem:[%s4848_s0 + $0x1c] sm:$0xff] }
  0x13   :  { %3508 = vmatpush3.bf16.msra.mxu1 %v3880_v23  ;;  %3491 = vmatprep.mubr.msk.bf16.mxu1 %vm95_vm0, %v60_v28  ;;  %v3892_v3 = vld [vmem:[%s4850_s2 + $0x48] sm:$0xff]   ;;  %v842_v5 = vpack.c.bf16 %v830_v2, %v829_v1  ;;  %v843_v10 = vpack.c.bf16 %v832_v7, %v831_v6  ;;  %v3893_v11 = vld [vmem:[%s4850_s2 + $0x40] sm:$0xff]   ;;  %v835_v13 = vld [vmem:[%s4848_s0 + $0x34] sm:$0xff] }
  0x14   :  { %3503 = vmatprep.mubr.msk.bf16.mxu0 %vm95_vm0, %v81_v9  ;;  %3509 = vmatprep.subr.bf16.mxu1 %v3881_v29  ;;  %v833_v8 = vld [vmem:[%s4848_s0 + $0x24] sm:$0xff]  ;;  %v834_v9 = vld [vmem:[%s4848_s0 + $0x2c] sm:$0xff] }
  0x15   :  { %3520 = vmatpush3.bf16.msra.mxu0 %v3882_v27  ;;  %v844_v12 = vpack.c.bf16 %v834_v9, %v833_v8 }
  0x16   :  { %3521 = vmatprep.subr.bf16.mxu0 %v3883_v32 }
  0x17   :  { %3510 = vmatpush3.bf16.msra.mxu1 %v3881_v29 }
  0x18   :  { %3531 = vmatprep.subr.bf16.mxu1 %v3884_v35 }
  0x19   :  { %3522 = vmatpush3.bf16.msra.mxu0 %v3883_v32 }
  0x1a   :  { %3492 = vmatmul.mubr.msk.bf16.gmra.mxu1 %vm95_vm0, %v61_v36  ;;  %3504 = vmatmul.mubr.msk.bf16.gmra.mxu0 %vm95_vm0, %v82_v14  ;;  %v836_v14 = vld [vmem:[%s4848_s0 + $0x3c] sm:$0xf] }
  0x1b   :  { %3511 = vmatprep.mubr.msk.bf16.mxu1 %vm95_vm0, %v58_v20  ;;  %3523 = vmatprep.mubr.msk.bf16.mxu0 %vm95_vm0, %v434_v37  ;;  %v845_v15 = vpack.c.bf16 %v836_v14, %v835_v13 }
  0x1c   :  { %3543 = vmatprep.subr.bf16.mxu0 %v3886_v38 }
  0x22   :  { %3512 = vmatmul.mubr.msk.bf16.vlgmr.msra.gmra.mxu1 %vm95_vm0, %v59_v26  ;;  %3524 = vmatmul.mubr.msk.bf16.vlgmr.msra.gmra.mxu0 %vm95_vm0, %v435_v43 }
  0x23   :  { %3532 = vmatpush3.bf16.msra.mxu1 %v3884_v35  ;;  %3515 = vmatprep.mubr.msk.bf16.mxu1 %vm95_vm0, %v60_v28 }
  0x24   :  { %3527 = vmatprep.mubr.msk.bf16.mxu0 %vm95_vm0, %v436_v44  ;;  %3533 = vmatprep.subr.bf16.mxu1 %v3885_v45 }
  0x25   :  { %3544 = vmatpush3.bf16.msra.mxu0 %v3886_v38 }
  0x26   :  { %3545 = vmatprep.subr.bf16.mxu0 %v3887_v48 }
  0x27   :  { %3534 = vmatpush3.bf16.msra.mxu1 %v3885_v45 }
  0x28   :  { %3555 = vmatprep.subr.bf16.mxu1 %v3888_v51 }
  0x29   :  { %3546 = vmatpush3.bf16.msra.mxu0 %v3887_v48 }
  0x2a   :  { %3516 = vmatmul.mubr.msk.bf16.gmra.mxu1 %vm95_vm0, %v61_v36  ;;  %3528 = vmatmul.mubr.msk.bf16.gmra.mxu0 %vm95_vm0, %v437_v52 }
  0x2b   :  { %3535 = vmatprep.mubr.msk.bf16.mxu1 %vm95_vm0, %v434_v37  ;;  %3547 = vmatprep.mubr.msk.bf16.mxu0 %vm95_vm0, %v638_v54 }
  0x2c   :  { %3567 = vmatprep.subr.bf16.mxu0 %v3890_v53 }
  0x32   :  { %3536 = vmatmul.mubr.msk.bf16.vlgmr.msra.gmra.mxu1 %vm95_vm0, %v435_v43  ;;  %3548 = vmatmul.mubr.msk.bf16.vlgmr.msra.gmra.mxu0 %vm95_vm0, %v639_v59 }
  0x33   :  { %3556 = vmatpush3.bf16.msra.mxu1 %v3888_v51  ;;  %3539 = vmatprep.mubr.msk.bf16.mxu1 %vm95_vm0, %v436_v44 }
  0x34   :  { %3551 = vmatprep.mubr.msk.bf16.mxu0 %vm95_vm0, %v640_v61  ;;  %3557 = vmatprep.subr.bf16.mxu1 %v3889_v60 }
  0x35   :  { %3568 = vmatpush3.bf16.msra.mxu0 %v3890_v53 }
  0x36   :  { %3569 = vmatprep.subr.bf16.mxu0 %v3891_v62 }
  0x37   :  { %3558 = vmatpush3.bf16.msra.mxu1 %v3889_v60 }
  0x38   :  { %3579 = vmatprep.subr.bf16.mxu1 %v3892_v3 }
  0x39   :  { %3570 = vmatpush3.bf16.msra.mxu0 %v3891_v62 }
  0x3a   :  { %3540 = vmatmul.mubr.msk.bf16.gmra.mxu1 %vm95_vm0, %v437_v52  ;;  %3552 = vmatmul.mubr.msk.bf16.gmra.mxu0 %vm95_vm0, %v641_v4 }
  0x3b   :  { %3559 = vmatprep.mubr.msk.bf16.mxu1 %vm95_vm0, %v638_v54  ;;  %3571 = vmatprep.mubr.msk.bf16.mxu0 %vm95_vm0, %v842_v5 }
  0x42   :  { %3560 = vmatmul.mubr.msk.bf16.vlgmr.msra.gmra.mxu1 %vm95_vm0, %v639_v59  ;;  %3572 = vmatmul.mubr.msk.bf16.vlgmr.msra.gmra.mxu0 %vm95_vm0, %v843_v10 }
  0x43   :  { %3580 = vmatpush3.bf16.msra.mxu1 %v3892_v3  ;;  %3563 = vmatprep.mubr.msk.bf16.mxu1 %vm95_vm0, %v640_v61 }
  0x44   :  { %3575 = vmatprep.mubr.msk.bf16.mxu0 %vm95_vm0, %v844_v12  ;;  %3581 = vmatprep.subr.bf16.mxu1 %v3893_v11 }
  0x47   :  { %3582 = vmatpush3.bf16.msra.mxu1 %v3893_v11 }
  0x4a   :  { %3564 = vmatmul.mubr.msk.bf16.gmra.mxu1 %vm95_vm0, %v641_v4  ;;  %3576 = vmatmul.mubr.msk.bf16.gmra.mxu0 %vm95_vm0, %v845_v15 }
  0x4b   :  { %3583 = vmatprep.mubr.msk.bf16.mxu1 %vm95_vm0, %v842_v5 }
  0x52   :  { %3584 = vmatmul.mubr.msk.bf16.vlgmr.msra.gmra.mxu1 %vm95_vm0, %v843_v10 }
  0x53   :  { %3587 = vmatprep.mubr.msk.bf16.mxu1 %vm95_vm0, %v844_v12 }
  0x5a   :  { %3588 = vmatmul.mubr.msk.bf16.gmra.mxu1 %vm95_vm0, %v845_v15 }
  0x5b   :  { %18 = vsyncpa [#allocation5], 0  ;;  %v3894_v16 = vld [vmem:[%s4852_s4 + $0x54] ss:$0 sps:$4 sm:$0x33]   ;;  %vm1191_vm1 = vcmask 1041408  }
  0x5c   :  { %v3895_v17 = vld [vmem:[%s4852_s4 + $0x28] ss:$0 sps:$4 sm:$0x33]   ;;  %3861 = vmatprep.subr.msk.bf16.mxu0 %vm1191_vm1, %v3894_v16  ;;  %v1193_v18 = vsel %vm1191_vm1, %v3894_v16, 0  ;;  %v3896_v20 = vld [vmem:[%s4852_s4 + $0x4c] sm:$0xff]   ;;  %v3897_v21 = vld [vmem:[%s4852_s4 + $0x20] sm:$0xff]  }
  0x5d   :  { %3862 = vmatprep.subr.msk.bf16.mxu1 %vm1191_vm1, %v3895_v17  ;;  %v1284_v19 = vsel %vm1191_vm1, %v3895_v17, 0  ;;  %3592 = vmatpush3.bf16.msra.mxu0 %v1193_v18  ;;  %v3898_v22 = vld [vmem:[%s4852_s4 + $0x44] sm:$0xff]   ;;  %v3899_v23 = vld [vmem:[%s4852_s4 + $0x18] sm:$0xff]   ;;  %vm1072_vm2 = vcmask 683008   ;;  %v3901_v25 = vld [vmem:[%s4852_s4 + $0x10] sm:$0xff]   ;;  %v4862_v26 = vmov 0.0  }
  0x5e   :  { %3608 = vmatpush3.bf16.msra.mxu1 %v1284_v19  ;;  %3593 = vmatprep.subr.bf16.mxu0 %v3896_v20  ;;  %v3900_v24 = vld [vmem:[%s4852_s4 + $0x3c] sm:$0xff]   ;;  %1074 = vst.msk [vmem:[#allocation2 + $0x3c] sm:$0xf] %vm1072_vm2, %v4862_v26  ;;  %v3902_v27 = vld [vmem:[%s4852_s4 + $0x34] sm:$0xff]   ;;  %v3903_v28 = vld [vmem:[%s4852_s4 + $0x8] sm:$0xff]   ;;  %vm1064_vm3 = vcmask 687104  }
  0x5f   :  { %3609 = vmatprep.subr.bf16.mxu1 %v3897_v21  ;;  %v3904_v29 = vld [vmem:[%s4852_s4 + $0x2c] sm:$0xff]   ;;  %v3905_v30 = vld [vmem:[%s4852_s4] sm:$0xff]   ;;  %v4357_v31 = vld [vmem:[%s4853_s5 + $0x54] ss:$0 sps:$4 sm:$0x33]   ;;  %vm2230_vm4 = vcmask 650240  }
  0x60   :  { %4866 = vst [vmem:[#allocation7_spill] sm:$0xff] %v4357_v31  ;;  %v4362_v32 = vld [vmem:[%s4853_s5 + $0x28] ss:$0 sps:$4 sm:$0x33]   ;;  %vm4020_vm5 = vmmov 0   ;;  %vm2226_vm6 = vcmask 654336  }
  0x61   :  { %3594 = vmatpush3.bf16.msra.mxu0 %v3896_v20  ;;  %4867 = vst [vmem:[#allocation8_spill] sm:$0xff] %v4362_v32  ;;  %vm2765_vm7 = vcmask 1043456   ;;  %vm2761_vm8 = vcmask 982016  }
  0x62   :  { %3610 = vmatpush3.bf16.msra.mxu1 %v3897_v21  ;;  %3595 = vmatprep.subr.bf16.mxu0 %v3898_v22 }
  0x63   :  { %3611 = vmatprep.subr.bf16.mxu1 %v3899_v23 }
  0x65   :  { %3596 = vmatpush3.bf16.msra.mxu0 %v3898_v22 }
  0x66   :  { %3612 = vmatpush3.bf16.msra.mxu1 %v3899_v23  ;;  %3597 = vmatprep.subr.bf16.mxu0 %v3900_v24 }
  0x67   :  { %3613 = vmatprep.subr.bf16.mxu1 %v3901_v25 }
  0x69   :  { %3598 = vmatpush3.bf16.msra.mxu0 %v3900_v24 }
  0x6a   :  { %3614 = vmatpush3.bf16.msra.mxu1 %v3901_v25  ;;  %3599 = vmatprep.subr.bf16.mxu0 %v3902_v27 }
  0x6b   :  { %3615 = vmatprep.subr.bf16.mxu1 %v3903_v28 }
  0x6d   :  { %3600 = vmatpush3.bf16.msra.mxu0 %v3902_v27 }
  0x6e   :  { %3616 = vmatpush3.bf16.msra.mxu1 %v3903_v28  ;;  %3601 = vmatprep.subr.bf16.mxu0 %v3904_v29 }
  0x6f   :  { %3617 = vmatprep.subr.bf16.mxu1 %v3905_v30 }
  0x71   :  { %3602 = vmatpush3.bf16.msra.mxu0 %v3904_v29 }
  0x72   :  { %3618 = vmatpush3.bf16.msra.mxu1 %v3905_v30  ;;  %3863 = vmatprep.subr.msk.bf16.mxu0 %vm1191_vm1, %v4357_v31 }
  0x73   :  { %3864 = vmatprep.subr.msk.bf16.mxu1 %vm1191_vm1, %v4362_v32 }
  0xca   :  { %v4368_v33 = vpop.f32.mrf.mxu0  ;;  %v4370_v34 = vpop.f32.mrf.mxu1 }
  0xcc   :  { %v4372_v35 = vpop.f32.mrf.mxu0  ;;  %v4374_v36 = vpop.f32.mrf.mxu1 }
  0xce   :  { %v4376_v37 = vpop.f32.mrf.mxu0  ;;  %v4378_v38 = vpop.f32.mrf.mxu1 }
  0xd0   :  { %v145_v39 = vpop.f32.mrf.mxu0  ;;  %v4380_v40 = vpop.f32.mrf.mxu1 }
  0xd2   :  { %v3489_v41 = vpop.f32.mrf.mxu1  ;;  %v3501_v42 = vpop.f32.mrf.mxu0 }
  0xd4   :  { %v231_v43 = vpop.f32.mrf.mxu1  ;;  %v4382_v44 = vpop.f32.mrf.mxu0 }
  0xd6   :  { %v3490_v45 = vpop.f32.mrf.mxu1  ;;  %v4384_v46 = vpop.f32.mrf.mxu0 }
  0xd8   :  { %v234_v47 = vpop.f32.mrf.mxu1  ;;  %v4386_v48 = vpop.f32.mrf.mxu0 }
  0xda   :  { %v3493_v49 = vpop.f32.mrf.mxu1  ;;  %v4388_v50 = vpop.f32.mrf.mxu0 }
  0xdc   :  { %v247_v51 = vpop.f32.mrf.mxu1  ;;  %v4390_v52 = vpop.f32.mrf.mxu0 }
  0xde   :  { %v3494_v53 = vpop.f32.mrf.mxu1  ;;  %v4392_v54 = vpop.f32.mrf.mxu0 }
  0xe0   :  { %v250_v55 = vpop.f32.mrf.mxu1  ;;  %v4394_v56 = vpop.f32.mrf.mxu0 }
  0xe1   :  { %4868 = vst [vmem:[#allocation9_spill] sm:$0xff] %v4394_v56 }
  0xe2   :  { %v3513_v57 = vpop.f32.mrf.mxu1  ;;  %v3525_v58 = vpop.f32.mrf.mxu0 }
  0xe4   :  { %v390_v59 = vpop.f32.mrf.mxu1  ;;  %v496_v60 = vpop.f32.mrf.mxu0 }
  0xe6   :  { %v3514_v61 = vpop.f32.mrf.mxu1  ;;  %v3526_v62 = vpop.f32.mrf.mxu0 }
  0xe8   :  { %v393_v63 = vpop.f32.mrf.mxu1  ;;  %v499_v0 = vpop.f32.mrf.mxu0 }
  0xea   :  { %v3517_v1 = vpop.f32.mrf.mxu1  ;;  %v3529_v2 = vpop.f32.mrf.mxu0 }
  0xec   :  { %v406_v3 = vpop.f32.mrf.mxu1  ;;  %v512_v4 = vpop.f32.mrf.mxu0 }
  0xee   :  { %v3518_v5 = vpop.f32.mrf.mxu1  ;;  %v4396_v6 = vpop.f32.mrf.mxu0 }
  0xef   :  { %4869 = vst [vmem:[#allocation10_spill] sm:$0xff] %v4396_v6 }
  0xf0   :  { %v4398_v7 = vpop.f32.mrf.mxu1  ;;  %v4400_v8 = vpop.f32.mrf.mxu0 }
  0xf1   :  { %4870 = vst [vmem:[#allocation11_spill] sm:$0xff] %v4398_v7  ;;  %4871 = vst [vmem:[#allocation12_spill] sm:$0xff] %v4400_v8  ;;  %v259_v8 = vadd.f32 %v3494_v53, %v4378_v38  ;;  %v251_v7 = vadd.f32 %v250_v55, %v4380_v40 }
  0xf2   :  { %v3537_v9 = vpop.f32.mrf.mxu1  ;;  %v3549_v10 = vpop.f32.mrf.mxu0 }
  0xf4   :  { %v586_v11 = vpop.f32.mrf.mxu1  ;;  %v700_v12 = vpop.f32.mrf.mxu0 }
  0xf6   :  { %v3538_v13 = vpop.f32.mrf.mxu1  ;;  %v3550_v14 = vpop.f32.mrf.mxu0 }
  0xf8   :  { %v589_v15 = vpop.f32.mrf.mxu1  ;;  %v4402_v16 = vpop.f32.mrf.mxu0 }
  0xf9   :  { %4872 = vst [vmem:[#allocation13_spill] sm:$0xff] %v4402_v16  ;;  %v248_v16 = vadd.f32 %v247_v51, %v4374_v36 }
  0xfa   :  { %v4404_v17 = vpop.f32.mrf.mxu1  ;;  %v4406_v18 = vpop.f32.mrf.mxu0 }
  0xfb   :  { %4873 = vst [vmem:[#allocation14_spill] sm:$0xff] %v4404_v17  ;;  %4874 = vst [vmem:[#allocation15_spill] sm:$0xff] %v4406_v18  ;;  %v531_v51 = vadd.f32 %v512_v4, %v248_v16 }
  0xfc   :  { %v4408_v19 = vpop.f32.mrf.mxu1  ;;  %v4410_v20 = vpop.f32.mrf.mxu0 }
  0xfd   :  { %4875 = vst [vmem:[#allocation16_spill] sm:$0xff] %v4408_v19  ;;  %4876 = vst [vmem:[#allocation17_spill] sm:$0xff] %v4410_v20  ;;  %v240_v19 = vadd.f32 %v3489_v41, %v4368_v33  ;;  %v232_v20 = vadd.f32 %v231_v43, %v4372_v35  ;;  %v391_v33 = vadd.f32 %v390_v59, %v4382_v44 }
  0xfe   :  { %v4412_v21 = vpop.f32.mrf.mxu1  ;;  %v4414_v22 = vpop.f32.mrf.mxu0  ;;  %v402_v41 = vadd.f32 %v3514_v61, %v4384_v46  ;;  %v415_v43 = vadd.f32 %v3517_v1, %v4388_v50  ;;  %v407_v44 = vadd.f32 %v406_v3, %v4390_v52  ;;  %v418_v46 = vadd.f32 %v3518_v5, %v4392_v54  ;;  %v4881_v50 = vld [vmem:[#allocation10_spill] sm:$0xff]  ;;  %v4882_v61 = vld [vmem:[#allocation9_spill] sm:$0xff] }
  0xff   :  { %4877 = vst [vmem:[#allocation18_spill] sm:$0xff] %v4412_v21  ;;  %4878 = vst [vmem:[#allocation19_spill] sm:$0xff] %v4414_v22  ;;  %v243_v22 = vadd.f32 %v3490_v45, %v4376_v37  ;;  %v235_v21 = vadd.f32 %v234_v47, %v145_v39  ;;  %v529_v56 = vadd.f32 %v3525_v58, %v240_v19  ;;  %v4445_v52 = vld [vmem:[%s4851_s3] ss:$0 sm:$0xff] }
 0x100   :  { %v4416_v23 = vpop.f32.mrf.mxu1  ;;  %v4418_v24 = vpop.f32.mrf.mxu0  ;;  %v527_v35 = vadd.f32 %v496_v60, %v232_v20  ;;  %v617_v45 = vadd.f32 %v586_v11, %v391_v33  ;;  %v534_v60 = vadd.f32 %v4881_v50, %v259_v8  ;;  %v4885_v11 = vld [vmem:[#allocation13_spill] sm:$0xff] }
 0x101   :  { %4879 = vst [vmem:[#allocation20_spill] sm:$0xff] %v4416_v23  ;;  %4880 = vst [vmem:[#allocation21_spill] sm:$0xff] %v4418_v24  ;;  %v256_v23 = vadd.f32 %v3493_v49, %v4370_v34  ;;  %v399_v24 = vadd.f32 %v3513_v57, %v3501_v42  ;;  %v530_v39 = vadd.f32 %v3526_v62, %v243_v22  ;;  %v4883_v62 = vld [vmem:[#allocation11_spill] sm:$0xff] }
 0x102   :  { %v3561_v25 = vpop.f32.mrf.mxu1  ;;  %v3573_v27 = vpop.f32.mrf.mxu0  ;;  %v394_v34 = vadd.f32 %v393_v63, %v4386_v48  ;;  %v528_v42 = vadd.f32 %v499_v0, %v235_v21  ;;  %v733_v40 = vadd.f32 %v3549_v10, %v529_v56  ;;  %v731_v53 = vadd.f32 %v700_v12, %v527_v35  ;;  %v4886_v12 = vld [vmem:[#allocation14_spill] sm:$0xff]  ;;  %v4887_v22 = vld [vmem:[#allocation15_spill] sm:$0xff] }
 0x103   :  { %v619_v37 = vadd.f32 %v3537_v9, %v399_v24  ;;  %v533_v38 = vadd.f32 %v3529_v2, %v256_v23  ;;  %v620_v57 = vadd.f32 %v3538_v13, %v402_v41  ;;  %v410_v63 = vadd.f32 %v4883_v62, %v4882_v61  ;;  %v4884_v9 = vld [vmem:[#allocation12_spill] sm:$0xff] }
 0x104   :  { %v790_v28 = vpop.f32.mrf.mxu1  ;;  %v904_v29 = vpop.f32.mrf.mxu0  ;;  %v937_v48 = vadd.f32 %v3573_v27, %v733_v40  ;;  %v734_v56 = vadd.f32 %v3550_v14, %v530_v39  ;;  %v618_v0 = vadd.f32 %v589_v15, %v394_v34  ;;  %v532_v10 = vadd.f32 %v4884_v9, %v251_v7  ;;  %v4888_v24 = vld [vmem:[#allocation16_spill] sm:$0xff] }
 0x105   :  { %v823_v47 = vadd.f32 %v3561_v25, %v619_v37  ;;  %v821_v58 = vadd.f32 %v790_v28, %v617_v45  ;;  %v935_v54 = vadd.f32 %v904_v29, %v731_v53  ;;  %v732_v8 = vadd.f32 %v4885_v11, %v528_v42 }
 0x106   :  { %v3562_v30 = vpop.f32.mrf.mxu1  ;;  %v3574_v32 = vpop.f32.mrf.mxu0  ;;  %v623_v13 = vadd.f32 %v4886_v12, %v415_v43  ;;  %v737_v23 = vadd.f32 %v4887_v22, %v533_v38  ;;  %v621_v25 = vadd.f32 %v4888_v24, %v407_v44  ;;  %v4891_v45 = vld [vmem:[#allocation19_spill] sm:$0xff] }
 0x107   :  { %v824_v2 = vadd.f32 %v3562_v30, %v620_v57  ;;  %v938_v16 = vadd.f32 %v3574_v32, %v734_v56  ;;  %v4889_v32 = vld [vmem:[#allocation17_spill] sm:$0xff] }
 0x108   :  { %v793_v26 = vpop.f32.mrf.mxu1  ;;  %v907_v17 = vpop.f32.mrf.mxu0  ;;  %v735_v37 = vadd.f32 %v4889_v32, %v531_v51  ;;  %v4892_v44 = vld [vmem:[#allocation20_spill] sm:$0xff] }
 0x109   :  { %v822_v15 = vadd.f32 %v793_v26, %v618_v0  ;;  %v936_v27 = vadd.f32 %v907_v17, %v732_v8  ;;  %v4890_v26 = vld [vmem:[#allocation18_spill] sm:$0xff]  ;;  %v622_v53 = vadd.f32 %v4892_v44, %v410_v63 }
 0x10a   :  { %v3565_v31 = vpop.f32.mrf.mxu1  ;;  %v3577_v49 = vpop.f32.mrf.mxu0  ;;  %v624_v39 = vadd.f32 %v4890_v26, %v418_v46  ;;  %v3909_v44 = vld [vmem:[%s4853_s5 + $0x20] sm:$0xff]  }
 0x10b   :  { %v827_v28 = vadd.f32 %v3565_v31, %v623_v13  ;;  %v941_v34 = vadd.f32 %v3577_v49, %v737_v23 }
 0x10c   :  { %v4422_v18 = vpop.f32.mrf.mxu1  ;;  %v920_v3 = vpop.f32.mrf.mxu0 }
 0x10d   :  { %v825_v42 = vadd.f32 %v4422_v18, %v621_v25 }
 0x10e   :  { %v4429_v6 = vpop.f32.mrf.mxu1  ;;  %v3578_v30 = vpop.f32.mrf.mxu0 }
 0x10f   :  { %v828_v51 = vadd.f32 %v4429_v6, %v624_v39 }
 0x110   :  { %v4435_v36 = vpop.f32.mrf.mxu1  ;;  %v923_v46 = vpop.f32.mrf.mxu0 }
 0x111   :  { %v826_v62 = vadd.f32 %v4435_v36, %v622_v53  ;;  %v3910_v53 = vld [vmem:[%s4853_s5 + $0x44] sm:$0xff]  }
 0x112   :  { %v3585_v55 = vpop.f32.mrf.mxu1 }
 0x113   :  { %v1027_v59 = vadd.f32 %v3585_v55, %v823_v47  ;;  %v738_v47 = vadd.f32 %v4891_v45, %v534_v60  ;;  %v939_v55 = vadd.f32 %v920_v3, %v735_v37 }
 0x114   :  { %v994_v1 = vpop.f32.mrf.mxu1 }
 0x115   :  { %v1035_v4 = vmax.f32 %v937_v48, %v1027_v59  ;;  %v1025_v5 = vadd.f32 %v994_v1, %v821_v58  ;;  %v4893_v59 = vld [vmem:[#allocation21_spill] sm:$0xff]  ;;  %v942_v61 = vadd.f32 %v3578_v30, %v738_v47 }
 0x116   :  { %v3586_v14 = vpop.f32.mrf.mxu1  ;;  %v736_v50 = vadd.f32 %v4893_v59, %v532_v10  ;;  %v3908_v47 = vld [vmem:[%s4853_s5 + $0x4c] sm:$0xff]  }
 0x117   :  { %v1050_v19 = vadd.f32 %v4445_v52, %v1035_v4  ;;  %v1033_v20 = vmax.f32 %v935_v54, %v1025_v5  ;;  %v1028_v21 = vadd.f32 %v3586_v14, %v824_v2 }
 0x118   :  { %v997_v29 = vpop.f32.mrf.mxu1  ;;  %v940_v1 = vadd.f32 %v923_v46, %v736_v50  ;;  %v3914_v46 = vld [vmem:[%s4853_s5 + $0x34] sm:$0xff]   ;;  %v3918_v50 = vld [vmem:[%s4852_s4 + $0x80] ss:$0 sps:$4 sm:$0x33]  }
 0x119   :  { %v1058_v7 = vmax.f32 %v1050_v19, 0.0  ;;  %v1048_v33 = vadd.f32 %v4445_v52, %v1033_v20  ;;  %v1036_v35 = vmax.f32 %v938_v16, %v1028_v21  ;;  %v1026_v41 = vadd.f32 %v997_v29, %v822_v15 }
 0x11a   :  { %v3589_v43 = vpop.f32.mrf.mxu1 }
 0x11b   :  { %1067 = vst.msk [vmem:[#allocation2 + $0x10] sm:$0xff] %vm1064_vm3, %v1058_v7  ;;  %v1056_v38 = vmax.f32 %v1048_v33, 0.0  ;;  %v1051_v31 = vadd.f32 %v4445_v52, %v1036_v35  ;;  %v1034_v17 = vmax.f32 %v936_v27, %v1026_v41  ;;  %v1031_v40 = vadd.f32 %v3589_v43, %v827_v28 }
 0x11c   :  { %v1010_v57 = vpop.f32.mrf.mxu1 }
 0x11d   :  { %1065 = vst.msk [vmem:[#allocation2] sm:$0xff] %vm1064_vm3, %v1056_v38  ;;  %v1059_v18 = vmax.f32 %v1051_v31, 0.0  ;;  %v1049_v49 = vadd.f32 %v4445_v52, %v1034_v17  ;;  %v1039_v48 = vmax.f32 %v941_v34, %v1031_v40  ;;  %v1029_v58 = vadd.f32 %v1010_v57, %v825_v42  ;;  %v4894_v38 = vld [vmem:[#allocation7_spill] sm:$0xff]  ;;  %v4895_v40 = vld [vmem:[#allocation8_spill] sm:$0xff] }
 0x11e   :  { %v3590_v60 = vpop.f32.mrf.mxu1  ;;  %v1381_v31 = vsel %vm1191_vm1, %v4894_v38, 0  ;;  %v1466_v45 = vsel %vm1191_vm1, %v4895_v40, 0  ;;  %v3913_v57 = vld [vmem:[%s4853_s5 + $0x10] sm:$0xff]  }
 0x11f   :  { %1068 = vst.msk [vmem:[#allocation2 + $0x18] sm:$0xff] %vm1064_vm3, %v1059_v18  ;;  %v1057_v63 = vmax.f32 %v1049_v49, 0.0  ;;  %v1054_v6 = vadd.f32 %v4445_v52, %v1039_v48  ;;  %v1037_v56 = vmax.f32 %v939_v55, %v1029_v58  ;;  %v1032_v0 = vadd.f32 %v3590_v60, %v828_v51  ;;  %v3911_v55 = vld [vmem:[%s4853_s5 + $0x18] sm:$0xff]   ;;  %v3915_v18 = vld [vmem:[%s4853_s5 + $0x8] sm:$0xff]   ;;  %v3917_v48 = vld [vmem:[%s4853_s5] sm:$0xff]  }
 0x120   :  { %v1013_v54 = vpop.f32.mrf.mxu1  ;;  %v3912_v51 = vld [vmem:[%s4853_s5 + $0x3c] sm:$0xff]   ;;  %v3916_v49 = vld [vmem:[%s4853_s5 + $0x2c] sm:$0xff]  }
 0x121   :  { %1066 = vst.msk [vmem:[#allocation2 + $0x8] sm:$0xff] %vm1064_vm3, %v1057_v63  ;;  %v1062_v2 = vmax.f32 %v1054_v6, 0.0  ;;  %v1052_v3 = vadd.f32 %v4445_v52, %v1037_v56  ;;  %v1040_v4 = vmax.f32 %v942_v61, %v1032_v0  ;;  %v1030_v5 = vadd.f32 %v1013_v54, %v826_v62  ;;  %v3919_v61 = vld [vmem:[%s4853_s5 + $0x80] ss:$0 sps:$4 sm:$0x33]  }
 0x122   :  { %v1591_v6 = vsel %vm1191_vm1, %v3918_v50, 0  ;;  %v1692_v0 = vsel %vm1191_vm1, %v3919_v61, 0 }
 0x123   :  { %1071 = vst.msk [vmem:[#allocation2 + $0x30] sm:$0xff] %vm1064_vm3, %v1062_v2  ;;  %v1060_v36 = vmax.f32 %v1052_v3, 0.0  ;;  %v1055_v9 = vadd.f32 %v4445_v52, %v1040_v4  ;;  %v1038_v10 = vmax.f32 %v940_v1, %v1030_v5  ;;  %v3920_v1 = vld [vmem:[%s4852_s4 + $0x78] sm:$0xff]   ;;  %v3922_v3 = vld [vmem:[%s4852_s4 + $0x70] sm:$0xff]   ;;  %v3924_v5 = vld [vmem:[%s4852_s4 + $0x68] sm:$0xff]  }
 0x124   :  { %v3921_v2 = vld [vmem:[%s4853_s5 + $0x78] sm:$0xff]   ;;  %v3923_v4 = vld [vmem:[%s4853_s5 + $0x70] sm:$0xff]  }
 0x125   :  { %1069 = vst.msk [vmem:[#allocation2 + $0x20] sm:$0xff] %vm1064_vm3, %v1060_v36  ;;  %v1063_v11 = vmax.f32 %v1055_v9, 0.0  ;;  %v1053_v8 = vadd.f32 %v4445_v52, %v1038_v10  ;;  %v3925_v36 = vld [vmem:[%s4853_s5 + $0x68] sm:$0xff]   ;;  %v3926_v9 = vld [vmem:[%s4852_s4 + $0x60] sm:$0xff]  }
 0x126   :  { %v1077_v12 = vld [vmem:[#allocation2 + $0x10] ss:$2 sm:$0xff]  ;;  %v1085_v13 = vld [vmem:[#allocation2 + $0x11] ss:$2 sm:$0xff]  ;;  %v3927_v10 = vld [vmem:[%s4853_s5 + $0x60] sm:$0xff]  }
 0x127   :  { %1073 = vst.msk [vmem:[#allocation2 + $0x38] sm:$0xf] %vm1072_vm2, %v1063_v11  ;;  %v1061_v16 = vmax.f32 %v1053_v8, 0.0  ;;  %v1091_v20 = vmax.f32 %v1077_v12, %v1085_v13  ;;  %v3928_v11 = vld [vmem:[%s4852_s4 + $0x58] sm:$0xff]  }
 0x128   :  { %v1075_v14 = vld [vmem:[#allocation2] ss:$2 sm:$0xff]  ;;  %v1083_v15 = vld [vmem:[#allocation2 + $0x1] ss:$2 sm:$0xff]  ;;  %v3929_v8 = vld [vmem:[%s4853_s5 + $0x58] sm:$0xff]  }
 0x129   :  { %1070 = vst.msk [vmem:[#allocation2 + $0x28] sm:$0xff] %vm1064_vm3, %v1061_v16  ;;  %v1090_v19 = vmax.f32 %v1075_v14, %v1083_v15  ;;  %v1119_v21 = vld [vmem:[#allocation2 + $0x2] ss:$2 sm:$0xff]  ;;  %v1127_v22 = vld [vmem:[#allocation2 + $0x3] ss:$2 sm:$0xff] }
 0x12a   :  { %v1134_v27 = vmax.f32 %v1119_v21, %v1127_v22  ;;  %v1081_v7 = vld [vmem:[#allocation2 + $0x30] ss:$2 sm:$0xf]  ;;  %v1089_v33 = vld [vmem:[#allocation2 + $0x31] ss:$2 sm:$0xf] }
 0x12b   :  { %v1105_v23 = vpack.c.bf16 %v1091_v20, %v1090_v19  ;;  %v1093_v42 = vmax.f32 %v1081_v7, %v1089_v33  ;;  %v1518_v62 = vld [vmem:[#allocation2 + $0x4] ss:$2 sm:$0xff]  ;;  %v1526_v60 = vld [vmem:[#allocation2 + $0x5] ss:$2 sm:$0xff] }
 0x12c   :  { %v1121_v24 = vld [vmem:[#allocation2 + $0x12] ss:$2 sm:$0xff]  ;;  %v1129_v25 = vld [vmem:[#allocation2 + $0x13] ss:$2 sm:$0xff]  ;;  %v1533_v56 = vmax.f32 %v1518_v62, %v1526_v60  ;;  %v3932_v7 = vld [vmem:[%s4852_s4 + $0xa4] sm:$0xff]  }
 0x12d   :  { %3619 = vmatprep.mubr.msk.bf16.mxu1 %vm1064_vm3, %v1105_v23  ;;  %v1135_v52 = vmax.f32 %v1121_v24, %v1129_v25  ;;  %v1520_v58 = vld [vmem:[#allocation2 + $0x14] ss:$2 sm:$0xff]  ;;  %v1528_v59 = vld [vmem:[#allocation2 + $0x15] ss:$2 sm:$0xff]  ;;  %v3946_v60 = vld [vmem:[%s4852_s4 + $0xc8] sm:$0xff]  }
 0x12e   :  { %v1125_v28 = vld [vmem:[#allocation2 + $0x32] ss:$2 sm:$0xf]  ;;  %v1133_v29 = vld [vmem:[#allocation2 + $0x33] ss:$2 sm:$0xf]  ;;  %v1534_v63 = vmax.f32 %v1520_v58, %v1528_v59 }
 0x12f   :  { %v1150_v30 = vpack.c.bf16 %v1135_v52, %v1134_v27  ;;  %v1137_v26 = vmax.f32 %v1125_v28, %v1133_v29  ;;  %v1750_v16 = vld [vmem:[#allocation2 + $0x16] ss:$2 sm:$0xff]  ;;  %v1758_v14 = vld [vmem:[#allocation2 + $0x17] ss:$2 sm:$0xff]  ;;  %v1756_v24 = vld [vmem:[#allocation2 + $0x7] ss:$2 sm:$0xff] }
 0x130   :  { %v1123_v35 = vld [vmem:[#allocation2 + $0x22] ss:$2 sm:$0xff]  ;;  %v1131_v41 = vld [vmem:[#allocation2 + $0x23] ss:$2 sm:$0xff]  ;;  %v1549_v54 = vpack.c.bf16 %v1534_v63, %v1533_v56  ;;  %v1764_v27 = vmax.f32 %v1750_v16, %v1758_v14  ;;  %v3957_v14 = vld [vmem:[%s4855_s7 + $0x18] sm:$0xff]  }
 0x131   :  { %v1079_v32 = vld [vmem:[#allocation2 + $0x20] ss:$2 sm:$0xff]  ;;  %3603 = vmatprep.mubr.msk.bf16.mxu0 %vm1064_vm3, %v1150_v30  ;;  %v1136_v37 = vmax.f32 %v1123_v35, %v1131_v41  ;;  %v1087_v39 = vld [vmem:[#allocation2 + $0x21] ss:$2 sm:$0xff]  ;;  %v3945_v62 = vld [vmem:[%s4853_s5 + $0xd0] sm:$0xff]  }
 0x132   :  { %v1092_v34 = vmax.f32 %v1079_v32, %v1087_v39  ;;  %v1522_v12 = vld [vmem:[#allocation2 + $0x24] ss:$2 sm:$0xff]  ;;  %v1530_v13 = vld [vmem:[#allocation2 + $0x25] ss:$2 sm:$0xff]  ;;  %v3934_v41 = vld [vmem:[%s4852_s4 + $0x9c] sm:$0xff]  }
 0x133   :  { %v1151_v43 = vpack.c.bf16 %v1137_v26, %v1136_v37  ;;  %v1524_v15 = vld [vmem:[#allocation2 + $0x34] ss:$2 sm:$0xf]  ;;  %v1532_v19 = vld [vmem:[#allocation2 + $0x35] ss:$2 sm:$0xf]  ;;  %v1535_v20 = vmax.f32 %v1522_v12, %v1530_v13 }
 0x134   :  { %v1106_v17 = vpack.c.bf16 %v1093_v42, %v1092_v34  ;;  %v3930_v21 = vld [vmem:[%s4852_s4 + $0xac] ss:$0 sps:$4 sm:$0x33]   ;;  %v1536_v25 = vmax.f32 %v1524_v15, %v1532_v19  ;;  %v3933_v35 = vld [vmem:[%s4853_s5 + $0xa4] sm:$0xff]   ;;  %v3935_v32 = vld [vmem:[%s4853_s5 + $0x9c] sm:$0xff]  }
 0x135   :  { %3604 = vmatmul.mubr.msk.bf16.vlgmr.msra.gmra.mxu0 %vm1064_vm3, %v1151_v43  ;;  %v3931_v22 = vld [vmem:[%s4853_s5 + $0xac] ss:$0 sps:$4 sm:$0x33]   ;;  %v1821_v28 = vsel %vm1191_vm1, %v3930_v21, 0  ;;  %v3936_v37 = vld [vmem:[%s4852_s4 + $0x94] sm:$0xff]   ;;  %v3940_v42 = vld [vmem:[%s4852_s4 + $0x84] sm:$0xff]  }
 0x136   :  { %3620 = vmatmul.mubr.msk.bf16.vlgmr.msra.gmra.mxu1 %vm1064_vm3, %v1106_v17  ;;  %3624 = vmatpush3.bf16.msra.mxu0 %v1381_v31  ;;  %v1550_v52 = vpack.c.bf16 %v1536_v25, %v1535_v20  ;;  %v3937_v26 = vld [vmem:[%s4853_s5 + $0x94] sm:$0xff]   ;;  %v3938_v39 = vld [vmem:[%s4852_s4 + $0x8c] sm:$0xff]   ;;  %v3949_v56 = vld [vmem:[%s4853_s5 + $0xc0] sm:$0xff]  }
 0x137   :  { %3640 = vmatpush3.bf16.msra.mxu1 %v1466_v45  ;;  %3635 = vmatprep.mubr.msk.bf16.mxu0 %vm1064_vm3, %v1150_v30  ;;  %v1922_v30 = vsel %vm1191_vm1, %v3931_v22, 0  ;;  %v3939_v34 = vld [vmem:[%s4853_s5 + $0x8c] sm:$0xff]   ;;  %v1762_v40 = vld [vmem:[#allocation2 + $0x37] ss:$2 sm:$0xf]  ;;  %v3955_v13 = vld [vmem:[%s4855_s7 + $0x20] sm:$0xff]  }
 0x138   :  { %3651 = vmatprep.mubr.msk.bf16.mxu1 %vm1064_vm3, %v1105_v23  ;;  %3625 = vmatprep.subr.bf16.mxu0 %v3908_v47  ;;  %v1748_v23 = vld [vmem:[#allocation2 + $0x6] ss:$2 sm:$0xff]  ;;  %v1760_v31 = vld [vmem:[#allocation2 + $0x27] ss:$2 sm:$0xff]  ;;  %v3958_v15 = vld [vmem:[%s4855_s7 + $0x38] sm:$0xff]  }
 0x139   :  { %3641 = vmatprep.subr.bf16.mxu1 %v3909_v44  ;;  %v1763_v29 = vmax.f32 %v1748_v23, %v1756_v24  ;;  %v1752_v38 = vld [vmem:[#allocation2 + $0x26] ss:$2 sm:$0xff] }
 0x13a   :  { %3626 = vmatpush3.bf16.msra.mxu0 %v3908_v47  ;;  %v1980_v45 = vld [vmem:[#allocation2 + $0x18] ss:$2 sm:$0xff]  ;;  %v1988_v47 = vld [vmem:[#allocation2 + $0x19] ss:$2 sm:$0xff]  ;;  %v3947_v63 = vld [vmem:[%s4853_s5 + $0xc8] sm:$0xff]  }
 0x13b   :  { %3642 = vmatpush3.bf16.msra.mxu1 %v3909_v44  ;;  %3627 = vmatprep.subr.bf16.mxu0 %v3910_v53  ;;  %v1779_v33 = vpack.c.bf16 %v1764_v27, %v1763_v29  ;;  %v1765_v44 = vmax.f32 %v1752_v38, %v1760_v31  ;;  %v3954_v12 = vld [vmem:[%s4855_s7 + $0x48] sm:$0xff]   ;;  %v3956_v16 = vld [vmem:[%s4855_s7 + $0x40] sm:$0xff]   ;;  %v3959_v19 = vld [vmem:[%s4855_s7 + $0x10] sm:$0xff]  }
 0x13c   :  { %3643 = vmatprep.subr.bf16.mxu1 %v3911_v55  ;;  %v3960_v20 = vld [vmem:[%s4855_s7 + $0x30] sm:$0xff]   ;;  %v3963_v23 = vld [vmem:[%s4855_s7] sm:$0xff]  }
 0x13e   :  { %3628 = vmatpush3.bf16.msra.mxu0 %v3910_v53  ;;  %v3942_v53 = vld [vmem:[%s4852_s4 + $0xd8] ss:$0 sps:$4 sm:$0x33]  }
 0x13f   :  { %3644 = vmatpush3.bf16.msra.mxu1 %v3911_v55  ;;  %3629 = vmatprep.subr.bf16.mxu0 %v3912_v51  ;;  %v3943_v55 = vld [vmem:[%s4853_s5 + $0xd8] ss:$0 sps:$4 sm:$0x33]  }
 0x140   :  { %3645 = vmatprep.subr.bf16.mxu1 %v3913_v57  ;;  %v2152_v59 = vsel %vm1191_vm1, %v3943_v55, 0 }
 0x142   :  { %3630 = vmatpush3.bf16.msra.mxu0 %v3912_v51  ;;  %v1978_v51 = vld [vmem:[#allocation2 + $0x8] ss:$2 sm:$0xff] }
 0x143   :  { %3646 = vmatpush3.bf16.msra.mxu1 %v3913_v57  ;;  %3631 = vmatprep.subr.bf16.mxu0 %v3914_v46  ;;  %v1986_v57 = vld [vmem:[#allocation2 + $0x9] ss:$2 sm:$0xff] }
 0x144   :  { %3647 = vmatprep.subr.bf16.mxu1 %v3915_v18  ;;  %v1993_v58 = vmax.f32 %v1978_v51, %v1986_v57 }
 0x146   :  { %3632 = vmatpush3.bf16.msra.mxu0 %v3914_v46 }
 0x147   :  { %3648 = vmatpush3.bf16.msra.mxu1 %v3915_v18  ;;  %3633 = vmatprep.subr.bf16.mxu0 %v3916_v49  ;;  %v1994_v18 = vmax.f32 %v1980_v45, %v1988_v47 }
 0x148   :  { %3649 = vmatprep.subr.bf16.mxu1 %v3917_v48 }
 0x14a   :  { %3634 = vmatpush3.bf16.msra.mxu0 %v3916_v49 }
 0x14b   :  { %3650 = vmatpush3.bf16.msra.mxu1 %v3917_v48  ;;  %3865 = vmatprep.subr.msk.bf16.mxu0 %vm1191_vm1, %v3918_v50  ;;  %v2051_v48 = vsel %vm1191_vm1, %v3942_v53, 0  ;;  %v3944_v50 = vld [vmem:[%s4852_s4 + $0xd0] sm:$0xff]  }
 0x14c   :  { %3866 = vmatprep.subr.msk.bf16.mxu1 %vm1191_vm1, %v3919_v61  ;;  %v2009_v61 = vpack.c.bf16 %v1994_v18, %v1993_v58 }
 0x14d   :  { %3636 = vmatmul.mubr.msk.bf16.vlgmr.msra.gmra.mxu0 %vm1064_vm3, %v1151_v43  ;;  %v3941_v43 = vld [vmem:[%s4853_s5 + $0x84] sm:$0xff]  }
 0x14e   :  { %3652 = vmatmul.mubr.msk.bf16.vlgmr.msra.gmra.mxu1 %vm1064_vm3, %v1106_v17  ;;  %3656 = vmatpush3.bf16.msra.mxu0 %v1591_v6  ;;  %v1754_v17 = vld [vmem:[#allocation2 + $0x36] ss:$2 sm:$0xf]  ;;  %v3948_v6 = vld [vmem:[%s4852_s4 + $0xc0] sm:$0xff]  }
 0x14f   :  { %3667 = vmatprep.mubr.msk.bf16.mxu0 %vm1064_vm3, %v1549_v54  ;;  %3672 = vmatpush3.bf16.msra.mxu1 %v1692_v0  ;;  %v1766_v46 = vmax.f32 %v1754_v17, %v1762_v40  ;;  %v3950_v0 = vld [vmem:[%s4852_s4 + $0xb8] sm:$0xff]  }
 0x150   :  { %3683 = vmatprep.mubr.msk.bf16.mxu1 %vm1064_vm3, %v1549_v54  ;;  %3657 = vmatprep.subr.bf16.mxu0 %v3920_v1  ;;  %v3952_v54 = vld [vmem:[%s4852_s4 + $0xb0] sm:$0xff]  }
 0x151   :  { %3673 = vmatprep.subr.bf16.mxu1 %v3921_v2  ;;  %v1780_v49 = vpack.c.bf16 %v1766_v46, %v1765_v44 }
 0x152   :  { %3658 = vmatpush3.bf16.msra.mxu0 %v3920_v1  ;;  %v3951_v1 = vld [vmem:[%s4853_s5 + $0xb8] sm:$0xff]  }
 0x153   :  { %3674 = vmatpush3.bf16.msra.mxu1 %v3921_v2  ;;  %3659 = vmatprep.subr.bf16.mxu0 %v3922_v3  ;;  %v3953_v2 = vld [vmem:[%s4853_s5 + $0xb0] sm:$0xff]  }
 0x154   :  { %3675 = vmatprep.subr.bf16.mxu1 %v3923_v4 }
 0x156   :  { %3660 = vmatpush3.bf16.msra.mxu0 %v3922_v3  ;;  %v1982_v3 = vld [vmem:[#allocation2 + $0x28] ss:$2 sm:$0xff] }
 0x157   :  { %3676 = vmatpush3.bf16.msra.mxu1 %v3923_v4  ;;  %3661 = vmatprep.subr.bf16.mxu0 %v3924_v5  ;;  %v1990_v4 = vld [vmem:[#allocation2 + $0x29] ss:$2 sm:$0xff] }
 0x158   :  { %3677 = vmatprep.subr.bf16.mxu1 %v3925_v36 }
 0x15a   :  { %3662 = vmatpush3.bf16.msra.mxu0 %v3924_v5  ;;  %v1984_v5 = vld [vmem:[#allocation2 + $0x38] ss:$2 sm:$0xf] }
 0x15b   :  { %3678 = vmatpush3.bf16.msra.mxu1 %v3925_v36  ;;  %3663 = vmatprep.subr.bf16.mxu0 %v3926_v9  ;;  %v1992_v36 = vld [vmem:[#allocation2 + $0x39] ss:$2 sm:$0xf] }
 0x15c   :  { %3679 = vmatprep.subr.bf16.mxu1 %v3927_v10 }
 0x15e   :  { %3664 = vmatpush3.bf16.msra.mxu0 %v3926_v9  ;;  %v1995_v9 = vmax.f32 %v1982_v3, %v1990_v4 }
 0x15f   :  { %3680 = vmatpush3.bf16.msra.mxu1 %v3927_v10  ;;  %3665 = vmatprep.subr.bf16.mxu0 %v3928_v11  ;;  %v1996_v10 = vmax.f32 %v1984_v5, %v1992_v36 }
 0x160   :  { %3681 = vmatprep.subr.bf16.mxu1 %v3929_v8 }
 0x162   :  { %3666 = vmatpush3.bf16.msra.mxu0 %v3928_v11  ;;  %v2010_v11 = vpack.c.bf16 %v1996_v10, %v1995_v9 }
 0x163   :  { %3682 = vmatpush3.bf16.msra.mxu1 %v3929_v8  ;;  %3867 = vmatprep.subr.msk.bf16.mxu0 %vm1191_vm1, %v3930_v21  ;;  %v4896_v8 = vmov 0.0   ;;  %v3961_v21 = vld [vmem:[%s4855_s7 + $0x8] sm:$0xff]  }
 0x164   :  { %3868 = vmatprep.subr.msk.bf16.mxu1 %vm1191_vm1, %v3931_v22  ;;  %v3962_v22 = vld [vmem:[%s4855_s7 + $0x28] sm:$0xff]  }
 0x165   :  { %3668 = vmatmul.mubr.msk.bf16.vlgmr.msra.gmra.mxu0 %vm1064_vm3, %v1550_v52 }
 0x166   :  { %3684 = vmatmul.mubr.msk.bf16.vlgmr.msra.gmra.mxu1 %vm1064_vm3, %v1550_v52  ;;  %3688 = vmatpush3.bf16.msra.mxu0 %v1821_v28 }
 0x167   :  { %3699 = vmatprep.mubr.msk.bf16.mxu0 %vm1064_vm3, %v1779_v33  ;;  %3704 = vmatpush3.bf16.msra.mxu1 %v1922_v30 }
 0x168   :  { %3715 = vmatprep.mubr.msk.bf16.mxu1 %vm1064_vm3, %v1779_v33  ;;  %3689 = vmatprep.subr.bf16.mxu0 %v3932_v7 }
 0x169   :  { %3705 = vmatprep.subr.bf16.mxu1 %v3933_v35 }
 0x16a   :  { %3690 = vmatpush3.bf16.msra.mxu0 %v3932_v7 }
 0x16b   :  { %3706 = vmatpush3.bf16.msra.mxu1 %v3933_v35  ;;  %3691 = vmatprep.subr.bf16.mxu0 %v3934_v41 }
 0x16c   :  { %3707 = vmatprep.subr.bf16.mxu1 %v3935_v32 }
 0x16e   :  { %3692 = vmatpush3.bf16.msra.mxu0 %v3934_v41 }
 0x16f   :  { %3708 = vmatpush3.bf16.msra.mxu1 %v3935_v32  ;;  %3693 = vmatprep.subr.bf16.mxu0 %v3936_v37 }
 0x170   :  { %3709 = vmatprep.subr.bf16.mxu1 %v3937_v26 }
 0x172   :  { %3694 = vmatpush3.bf16.msra.mxu0 %v3936_v37 }
 0x173   :  { %3710 = vmatpush3.bf16.msra.mxu1 %v3937_v26  ;;  %3695 = vmatprep.subr.bf16.mxu0 %v3938_v39 }
 0x174   :  { %3711 = vmatprep.subr.bf16.mxu1 %v3939_v34 }
 0x176   :  { %3696 = vmatpush3.bf16.msra.mxu0 %v3938_v39 }
 0x177   :  { %3712 = vmatpush3.bf16.msra.mxu1 %v3939_v34  ;;  %3697 = vmatprep.subr.bf16.mxu0 %v3940_v42 }
 0x178   :  { %3713 = vmatprep.subr.bf16.mxu1 %v3941_v43 }
 0x17a   :  { %3698 = vmatpush3.bf16.msra.mxu0 %v3940_v42 }
 0x17b   :  { %3714 = vmatpush3.bf16.msra.mxu1 %v3941_v43  ;;  %3869 = vmatprep.subr.msk.bf16.mxu0 %vm1191_vm1, %v3942_v53 }
 0x17c   :  { %3870 = vmatprep.subr.msk.bf16.mxu1 %vm1191_vm1, %v3943_v55 }
 0x17d   :  { %3700 = vmatmul.mubr.msk.bf16.vlgmr.msra.gmra.mxu0 %vm1064_vm3, %v1780_v49 }
 0x17e   :  { %3716 = vmatmul.mubr.msk.bf16.vlgmr.msra.gmra.mxu1 %vm1064_vm3, %v1780_v49  ;;  %3720 = vmatpush3.bf16.msra.mxu0 %v2051_v48 }
 0x17f   :  { %3731 = vmatprep.mubr.msk.bf16.mxu0 %vm1064_vm3, %v2009_v61  ;;  %3736 = vmatpush3.bf16.msra.mxu1 %v2152_v59 }
 0x180   :  { %3747 = vmatprep.mubr.msk.bf16.mxu1 %vm1064_vm3, %v2009_v61  ;;  %3721 = vmatprep.subr.bf16.mxu0 %v3944_v50 }
 0x181   :  { %3737 = vmatprep.subr.bf16.mxu1 %v3945_v62 }
 0x182   :  { %3722 = vmatpush3.bf16.msra.mxu0 %v3944_v50 }
 0x183   :  { %3738 = vmatpush3.bf16.msra.mxu1 %v3945_v62  ;;  %3723 = vmatprep.subr.bf16.mxu0 %v3946_v60 }
 0x184   :  { %3739 = vmatprep.subr.bf16.mxu1 %v3947_v63 }
 0x186   :  { %3724 = vmatpush3.bf16.msra.mxu0 %v3946_v60 }
 0x187   :  { %3740 = vmatpush3.bf16.msra.mxu1 %v3947_v63  ;;  %3725 = vmatprep.subr.bf16.mxu0 %v3948_v6 }
 0x188   :  { %3741 = vmatprep.subr.bf16.mxu1 %v3949_v56 }
 0x18a   :  { %3726 = vmatpush3.bf16.msra.mxu0 %v3948_v6 }
 0x18b   :  { %3742 = vmatpush3.bf16.msra.mxu1 %v3949_v56  ;;  %3727 = vmatprep.subr.bf16.mxu0 %v3950_v0 }
 0x18c   :  { %3743 = vmatprep.subr.bf16.mxu1 %v3951_v1 }
 0x18e   :  { %3728 = vmatpush3.bf16.msra.mxu0 %v3950_v0 }
 0x18f   :  { %3744 = vmatpush3.bf16.msra.mxu1 %v3951_v1  ;;  %3729 = vmatprep.subr.bf16.mxu0 %v3952_v54 }
 0x190   :  { %3745 = vmatprep.subr.bf16.mxu1 %v3953_v2 }
 0x192   :  { %3730 = vmatpush3.bf16.msra.mxu0 %v3952_v54 }
 0x193   :  { %3746 = vmatpush3.bf16.msra.mxu1 %v3953_v2  ;;  %3751 = vmatprep.subr.bf16.mxu0 %v4896_v8 }
 0x194   :  { %3765 = vmatprep.subr.bf16.mxu1 %v4896_v8 }
 0x195   :  { %3732 = vmatmul.mubr.msk.bf16.vlgmr.msra.gmra.mxu0 %vm1064_vm3, %v2010_v11 }
 0x196   :  { %3748 = vmatmul.mubr.msk.bf16.vlgmr.msra.gmra.mxu1 %vm1064_vm3, %v2010_v11  ;;  %3752 = vmatpush3.bf16.msra.mxu0 %v3954_v12 }
 0x197   :  { %3766 = vmatpush3.bf16.msra.mxu1 %v3955_v13  ;;  %3753 = vmatprep.subr.bf16.mxu0 %v4896_v8 }
 0x198   :  { %3767 = vmatprep.subr.bf16.mxu1 %v4896_v8  ;;  %3761 = vmatprep.mubr.msk.bf16.mxu0 %vm4020_vm5, %v4896_v8 }
 0x199   :  { %3775 = vmatprep.mubr.msk.bf16.mxu1 %vm4020_vm5, %v4896_v8 }
 0x19a   :  { %3754 = vmatpush3.bf16.msra.mxu0 %v3956_v16 }
 0x19b   :  { %3768 = vmatpush3.bf16.msra.mxu1 %v3957_v14  ;;  %3755 = vmatprep.subr.bf16.mxu0 %v4896_v8 }
 0x19c   :  { %3769 = vmatprep.subr.bf16.mxu1 %v4896_v8 }
 0x19e   :  { %3756 = vmatpush3.bf16.msra.mxu0 %v3958_v15  ;;  %v3195_v15 = vld [vmem:[%s4854_s6] ss:$0 sm:$0xff] }
 0x19f   :  { %3770 = vmatpush3.bf16.msra.mxu1 %v3959_v19  ;;  %3757 = vmatprep.subr.bf16.mxu0 %v4896_v8 }
 0x1a0   :  { %3771 = vmatprep.subr.bf16.mxu1 %v4896_v8 }
 0x1a2   :  { %3758 = vmatpush3.bf16.msra.mxu0 %v3960_v20 }
 0x1a3   :  { %3772 = vmatpush3.bf16.msra.mxu1 %v3961_v21  ;;  %3759 = vmatprep.subr.bf16.mxu0 %v4896_v8 }
 0x1a4   :  { %3773 = vmatprep.subr.bf16.mxu1 %v4896_v8 }
 0x1a6   :  { %3760 = vmatpush3.bf16.msra.mxu0 %v3962_v22 }
 0x1a7   :  { %3774 = vmatpush3.bf16.msra.mxu1 %v3963_v23  ;;  %3779 = vmatprep.subr.bf16.mxu0 %v4896_v8 }
 0x1a8   :  { %3793 = vmatprep.subr.bf16.mxu1 %v4896_v8 }
 0x1f5   :  { %v3605_v24 = vpop.f32.mrf.mxu0 }
 0x1f6   :  { %v3621_v25 = vpop.f32.mrf.mxu1 }
 0x1f7   :  { %v1229_v27 = vpop.f32.mrf.mxu0  ;;  %v1329_v46 = vadd.f32 %v3621_v25, %v3605_v24 }
 0x1f8   :  { %v1320_v52 = vpop.f32.mrf.mxu1 }
 0x1f9   :  { %v3606_v28 = vpop.f32.mrf.mxu0  ;;  %v1321_v48 = vadd.f32 %v1320_v52, %v1229_v27 }
 0x1fa   :  { %v3622_v29 = vpop.f32.mrf.mxu1 }
 0x1fb   :  { %v1232_v30 = vpop.f32.mrf.mxu0  ;;  %v1332_v62 = vadd.f32 %v3622_v29, %v3606_v28 }
 0x1fc   :  { %v1323_v7 = vpop.f32.mrf.mxu1 }
 0x1fd   :  { %v1324_v2 = vadd.f32 %v1323_v7, %v1232_v30 }
 0x20d   :  { %v3637_v33 = vpop.f32.mrf.mxu0 }
 0x20e   :  { %v3653_v35 = vpop.f32.mrf.mxu1 }
 0x20f   :  { %v1417_v41 = vpop.f32.mrf.mxu0  ;;  %v1511_v49 = vadd.f32 %v3653_v35, %v3637_v33 }
 0x210   :  { %v1502_v32 = vpop.f32.mrf.mxu1 }
 0x211   :  { %v3638_v37 = vpop.f32.mrf.mxu0  ;;  %v1503_v59 = vadd.f32 %v1502_v32, %v1417_v41 }
 0x212   :  { %v3654_v26 = vpop.f32.mrf.mxu1 }
 0x213   :  { %v1420_v39 = vpop.f32.mrf.mxu0  ;;  %v1514_v56 = vadd.f32 %v3654_v26, %v3638_v37 }
 0x214   :  { %v1505_v34 = vpop.f32.mrf.mxu1 }
 0x215   :  { %v1506_v9 = vadd.f32 %v1505_v34, %v1420_v39 }
 0x225   :  { %v3669_v42 = vpop.f32.mrf.mxu0 }
 0x226   :  { %v3685_v43 = vpop.f32.mrf.mxu1  ;;  %v1644_v58 = vadd.f32 %v3669_v42, %v1329_v46 }
 0x227   :  { %v1627_v38 = vpop.f32.mrf.mxu0  ;;  %v1745_v50 = vadd.f32 %v3685_v43, %v1511_v49 }
 0x228   :  { %v1728_v31 = vpop.f32.mrf.mxu1  ;;  %v1642_v60 = vadd.f32 %v1627_v38, %v1321_v48  ;;  %v3966_v48 = vld [vmem:[%s4855_s7 + $0x68] sm:$0xff]  }
 0x229   :  { %v3670_v17 = vpop.f32.mrf.mxu0  ;;  %v1743_v0 = vadd.f32 %v1728_v31, %v1503_v59  ;;  %v3968_v59 = vld [vmem:[%s4855_s7 + $0x60] sm:$0xff]  }
 0x22a   :  { %v3686_v40 = vpop.f32.mrf.mxu1  ;;  %v1645_v3 = vadd.f32 %v3670_v17, %v1332_v62  ;;  %v3971_v62 = vld [vmem:[%s4855_s7 + $0x80] sm:$0xff]  }
 0x22b   :  { %v1630_v45 = vpop.f32.mrf.mxu0  ;;  %v1746_v10 = vadd.f32 %v3686_v40, %v1514_v56 }
 0x22c   :  { %v1731_v47 = vpop.f32.mrf.mxu1  ;;  %v1643_v16 = vadd.f32 %v1630_v45, %v1324_v2 }
 0x22d   :  { %v1744_v21 = vadd.f32 %v1731_v47, %v1506_v9  ;;  %v3976_v9 = vld [vmem:[%s4855_s7 + $0xb0] sm:$0xff]  }
 0x23d   :  { %v3701_v44 = vpop.f32.mrf.mxu0 }
 0x23e   :  { %v3717_v53 = vpop.f32.mrf.mxu1  ;;  %v1874_v63 = vadd.f32 %v3701_v44, %v1644_v58  ;;  %v3967_v58 = vld [vmem:[%s4855_s7 + $0x90] sm:$0xff]  }
 0x23f   :  { %v1857_v55 = vpop.f32.mrf.mxu0  ;;  %v1975_v1 = vadd.f32 %v3717_v53, %v1745_v50  ;;  %v3969_v50 = vld [vmem:[%s4855_s7 + $0x88] sm:$0xff]  }
 0x240   :  { %v1958_v51 = vpop.f32.mrf.mxu1  ;;  %v1872_v4 = vadd.f32 %v1857_v55, %v1642_v60 }
 0x241   :  { %v3702_v57 = vpop.f32.mrf.mxu0  ;;  %v1973_v11 = vadd.f32 %v1958_v51, %v1743_v0  ;;  %v3972_v0 = vld [vmem:[%s4855_s7 + $0x50] sm:$0xff]  }
 0x242   :  { %v3718_v18 = vpop.f32.mrf.mxu1  ;;  %v1875_v14 = vadd.f32 %v3702_v57, %v1645_v3  ;;  %v3964_v57 = vld [vmem:[%s4855_s7 + $0x70] sm:$0xff]   ;;  %v3974_v3 = vld [vmem:[%s4855_s7 + $0xc0] sm:$0xff]  }
 0x243   :  { %v1860_v61 = vpop.f32.mrf.mxu0  ;;  %v1976_v22 = vadd.f32 %v3718_v18, %v1746_v10  ;;  %v3965_v18 = vld [vmem:[%s4855_s7 + $0x98] sm:$0xff]   ;;  %v3977_v10 = vld [vmem:[%s4855_s7 + $0xa8] sm:$0xff]  }
 0x244   :  { %v1961_v6 = vpop.f32.mrf.mxu1  ;;  %v1873_v27 = vadd.f32 %v1860_v61, %v1643_v16  ;;  %v3970_v61 = vld [vmem:[%s4855_s7 + $0x58] sm:$0xff]  }
 0x245   :  { %v1974_v29 = vadd.f32 %v1961_v6, %v1744_v21  ;;  %v3981_v21 = vld [vmem:[%s4857_s9 + $0x28] sm:$0xff]  }
 0x255   :  { %v3733_v54 = vpop.f32.mrf.mxu0 }
 0x256   :  { %v2104_v5 = vadd.f32 %v3733_v54, %v1874_v63  ;;  %v3749_v36 = vpop.f32.mrf.mxu1 }
 0x257   :  { %v2205_v12 = vadd.f32 %v3749_v36, %v1975_v1  ;;  %v2087_v13 = vpop.f32.mrf.mxu0  ;;  %v3973_v1 = vld [vmem:[%s4855_s7 + $0x78] sm:$0xff]  }
 0x258   :  { %v2102_v19 = vadd.f32 %v2087_v13, %v1872_v4  ;;  %v2188_v20 = vpop.f32.mrf.mxu1  ;;  %v3975_v36 = vld [vmem:[%s4855_s7 + $0xb8] sm:$0xff]   ;;  %v3978_v13 = vld [vmem:[%s4855_s7 + $0xa0] sm:$0xff]  }
 0x259   :  { %v2209_v23 = vmax.f32 %v2104_v5, %v2205_v12  ;;  %v2203_v24 = vadd.f32 %v2188_v20, %v1973_v11  ;;  %v3734_v25 = vpop.f32.mrf.mxu0  ;;  %v3980_v20 = vld [vmem:[%s4857_s9 + $0x30] sm:$0xff]  }
 0x25a   :  { %v2105_v52 = vadd.f32 %v3734_v25, %v1875_v14  ;;  %v3750_v28 = vpop.f32.mrf.mxu1  ;;  %v3985_v25 = vld [vmem:[%s4857_s9 + $0x8] sm:$0xff]  }
 0x25b   :  { %v2220_v30 = vadd.f32 %v3195_v15, %v2209_v23  ;;  %v2207_v7 = vmax.f32 %v2102_v19, %v2203_v24  ;;  %v2206_v33 = vadd.f32 %v3750_v28, %v1976_v22  ;;  %v2090_v35 = vpop.f32.mrf.mxu0  ;;  %v3982_v22 = vld [vmem:[%s4857_s9 + $0x20] sm:$0xff]   ;;  %v3983_v23 = vld [vmem:[%s4857_s9 + $0x18] sm:$0xff]   ;;  %v3984_v24 = vld [vmem:[%s4857_s9 + $0x10] sm:$0xff]  }
 0x25c   :  { %v2103_v41 = vadd.f32 %v2090_v35, %v1873_v27  ;;  %v2191_v32 = vpop.f32.mrf.mxu1  ;;  %v3986_v27 = vld [vmem:[%s4857_s9] sm:$0xff]  }
 0x25d   :  { %v2224_v37 = vmax.f32 %v2220_v30, 0.0  ;;  %v2218_v26 = vadd.f32 %v3195_v15, %v2207_v7  ;;  %v2210_v39 = vmax.f32 %v2105_v52, %v2206_v33  ;;  %v2204_v34 = vadd.f32 %v2191_v32, %v1974_v29  ;;  %v3987_v52 = vld [vmem:[%s4859_s11 + $0x28] ss:$0 sps:$4 sm:$0x33]   ;;  %v3988_v29 = vld [vmem:[%s4859_s11 + $0x20] sm:$0xff]   ;;  %v3989_v30 = vld [vmem:[%s4859_s11 + $0x18] sm:$0xff]  }
 0x25e   :  { %v2866_v28 = vsel %vm1191_vm1, %v3987_v52, 0  ;;  %v3990_v7 = vld [vmem:[%s4859_s11 + $0x10] sm:$0xff]  }
 0x25f   :  { %2229 = vst.msk [vmem:[#allocation3 + $0x10] sm:$0xff] %vm2226_vm6, %v2224_v37  ;;  %v2222_v42 = vmax.f32 %v2218_v26, 0.0  ;;  %v2221_v43 = vadd.f32 %v3195_v15, %v2210_v39  ;;  %v2208_v38 = vmax.f32 %v2103_v41, %v2204_v34 }
 0x261   :  { %2227 = vst.msk [vmem:[#allocation3] sm:$0xff] %vm2226_vm6, %v2222_v42  ;;  %v2225_v31 = vmax.f32 %v2221_v43, 0.0  ;;  %v2219_v17 = vadd.f32 %v3195_v15, %v2208_v38  ;;  %v3979_v15 = vld [vmem:[%s4857_s9 + $0x38] ss:$0 sps:$4 sm:$0xff]  }
 0x262   :  { %v2767_v19 = vsel %vm2765_vm7, %v3979_v15, 0 }
 0x263   :  { %2231 = vst.msk [vmem:[#allocation3 + $0x18] sm:$0xf] %vm2230_vm4, %v2225_v31  ;;  %v2223_v40 = vmax.f32 %v2219_v17, 0.0 }
 0x265   :  { %2228 = vst.msk [vmem:[#allocation3 + $0x8] sm:$0xff] %vm2226_vm6, %v2223_v40 }
 0x268   :  { %v2249_v45 = vld [vmem:[#allocation3 + $0x2] ss:$16 sm:$0x3]  ;;  %v2251_v47 = vld [vmem:[#allocation3 + $0x3] ss:$16 sm:$0x3] }
 0x269   :  { %v2252_v44 = vmax.f32 %v2249_v45, %v2251_v47  ;;  %v2233_v53 = vld [vmem:[#allocation3] ss:$16 sm:$0x3]  ;;  %v2235_v55 = vld [vmem:[#allocation3 + $0x1] ss:$16 sm:$0x3] }
 0x26a   :  { %v2236_v51 = vmax.f32 %v2233_v53, %v2235_v55  ;;  %v2412_v60 = vld [vmem:[#allocation3 + $0x4] ss:$16 sm:$0x3]  ;;  %v2414_v63 = vld [vmem:[#allocation3 + $0x5] ss:$16 sm:$0x3] }
 0x26b   :  { %v2264_v46 = vpack.c.bf16 %v2252_v44, %v2252_v44  ;;  %v2503_v6 = vld [vmem:[#allocation3 + $0x6] ss:$16 sm:$0x3]  ;;  %v2505_v56 = vld [vmem:[#allocation3 + $0x7] ss:$16 sm:$0x3]  ;;  %v2415_v54 = vmax.f32 %v2412_v60, %v2414_v63 }
 0x26c   :  { %v2247_v49 = vpack.c.bf16 %v2236_v51, %v2236_v51  ;;  %v2506_v2 = vmax.f32 %v2503_v6, %v2505_v56  ;;  %v2594_v11 = vld [vmem:[#allocation3 + $0x8] ss:$16 sm:$0x3]  ;;  %v2596_v12 = vld [vmem:[#allocation3 + $0x9] ss:$16 sm:$0x3] }
 0x26d   :  { %3762 = vmatmul.mubr.msk.bf16.vlgmr.msra.gmra.mxu0 %vm2226_vm6, %v2264_v46  ;;  %v2427_v4 = vpack.c.bf16 %v2415_v54, %v2415_v54  ;;  %v2597_v16 = vmax.f32 %v2594_v11, %v2596_v12  ;;  %v3267_v60 = vld [vmem:[%s4858_s10] ss:$0 sm:$0xff]  ;;  %s4021_s10 = smov [#allocation4]  }
 0x26e   :  { %3776 = vmatmul.mubr.msk.bf16.vlgmr.msra.gmra.mxu1 %vm2226_vm6, %v2247_v49  ;;  %3780 = vmatpush3.bf16.msra.mxu0 %v3964_v57  ;;  %v2518_v5 = vpack.c.bf16 %v2506_v2, %v2506_v2  ;;  %v3266_v57 = vld [vmem:[%s4856_s8] ss:$0 sm:$0xff] }
 0x26f   :  { %3794 = vmatpush3.bf16.msra.mxu1 %v3965_v18  ;;  %3781 = vmatprep.subr.bf16.mxu0 %v4896_v8  ;;  %v2609_v14 = vpack.c.bf16 %v2597_v16, %v2597_v16 }
 0x270   :  { %3795 = vmatprep.subr.bf16.mxu1 %v4896_v8  ;;  %3789 = vmatprep.mubr.msk.bf16.mxu0 %vm4020_vm5, %v4896_v8 }
 0x271   :  { %3803 = vmatprep.mubr.msk.bf16.mxu1 %vm4020_vm5, %v4896_v8 }
 0x272   :  { %3782 = vmatpush3.bf16.msra.mxu0 %v3966_v48 }
 0x273   :  { %3796 = vmatpush3.bf16.msra.mxu1 %v3967_v58  ;;  %3783 = vmatprep.subr.bf16.mxu0 %v4896_v8 }
 0x274   :  { %3797 = vmatprep.subr.bf16.mxu1 %v4896_v8 }
 0x276   :  { %3784 = vmatpush3.bf16.msra.mxu0 %v3968_v59 }
 0x277   :  { %3798 = vmatpush3.bf16.msra.mxu1 %v3969_v50  ;;  %3785 = vmatprep.subr.bf16.mxu0 %v4896_v8 }
 0x278   :  { %3799 = vmatprep.subr.bf16.mxu1 %v4896_v8 }
 0x27a   :  { %3786 = vmatpush3.bf16.msra.mxu0 %v3970_v61  ;;  %v3991_v61 = vld [vmem:[%s4859_s11 + $0x8] sm:$0xff]  }
 0x27b   :  { %3800 = vmatpush3.bf16.msra.mxu1 %v3971_v62  ;;  %3787 = vmatprep.subr.bf16.mxu0 %v4896_v8  ;;  %v3992_v62 = vld [vmem:[%s4859_s11] sm:$0xff]   ;;  %s2926_s11 = sshll.u32 %s4021_s10, 4  ;;  %s2927_s11 = int_to_ptr.vmem [resolvable:$true] %s2926_s11 }
 0x27c   :  { %3801 = vmatprep.subr.bf16.mxu1 %v4896_v8  ;;  %p4002_p1 = scmp.lt.s32.totalorder %s2927_s11, %s2927_s11 }
 0x27e   :  { %3788 = vmatpush3.bf16.msra.mxu0 %v3972_v0 }
 0x27f   :  { %3802 = vmatpush3.bf16.msra.mxu1 %v3973_v1  ;;  %3807 = vmatprep.subr.bf16.mxu0 %v4896_v8 }
 0x280   :  { %3821 = vmatprep.subr.bf16.mxu1 %v4896_v8 }
 0x281   :  { %3790 = vmatmul.mubr.msk.bf16.vlgmr.msra.gmra.mxu0 %vm2226_vm6, %v2427_v4 }
 0x282   :  { %3804 = vmatmul.mubr.msk.bf16.vlgmr.msra.gmra.mxu1 %vm2226_vm6, %v2518_v5  ;;  %3808 = vmatpush3.bf16.msra.mxu0 %v3974_v3  ;;  %v3277_v3 = vld [vmem:[%s4860_s12] ss:$0 sm:$0xff]  ;;  %s3997_s12 = scalar_lea.vmem %s2927_s11, 32 }
 0x283   :  { %3809 = vmatprep.subr.bf16.mxu0 %v4896_v8  ;;  %3817 = vmatprep.mubr.msk.bf16.mxu0 %vm4020_vm5, %v4896_v8  ;;  %p3998_p0 = scmp.ne.s32.totalorder %s2927_s11, %s3997_s12  ;;  %p4003_p2 = scmp.lt.s32.totalorder %s3997_s12, %s3997_s12 }
 0x284   :  { %3837 = vmatprep.mubr.msk.bf16.mxu1 %vm4020_vm5, %v4896_v8  ;;  %3822 = vmatpush3.bf16.msra.mxu1 %v2767_v19 }
 0x285   :  { %3823 = vmatprep.subr.bf16.mxu1 %v4896_v8  ;;  %p4004_p3 = por %p4003_p2, %p4002_p1 }
 0x286   :  { %3810 = vmatpush3.bf16.msra.mxu0 %v3975_v36 }
 0x287   :  { %3811 = vmatprep.subr.bf16.mxu0 %v4896_v8  ;;  %p4005_p4 = pnand %p4004_p3, %p3998_p0 }
 0x288   :  { %3824 = vmatpush3.bf16.msra.mxu1 %v3980_v20 }
 0x289   :  { %3825 = vmatprep.subr.bf16.mxu1 %v4896_v8 }
 0x28a   :  { %3812 = vmatpush3.bf16.msra.mxu0 %v3976_v9 }
 0x28b   :  { %3813 = vmatprep.subr.bf16.mxu0 %v4896_v8 }
 0x28c   :  { %3826 = vmatpush3.bf16.msra.mxu1 %v3981_v21 }
 0x28d   :  { %3827 = vmatprep.subr.bf16.mxu1 %v4896_v8 }
 0x28e   :  { %3814 = vmatpush3.bf16.msra.mxu0 %v3977_v10 }
 0x28f   :  { %3815 = vmatprep.subr.bf16.mxu0 %v4896_v8 }
 0x290   :  { %3828 = vmatpush3.bf16.msra.mxu1 %v3982_v22 }
 0x291   :  { %3829 = vmatprep.subr.bf16.mxu1 %v4896_v8 }
 0x292   :  { %3816 = vmatpush3.bf16.msra.mxu0 %v3978_v13 }
 0x293   :  { %3841 = vmatprep.subr.bf16.mxu0 %v4896_v8 }
 0x294   :  { %3830 = vmatpush3.bf16.msra.mxu1 %v3983_v23 }
 0x295   :  { %3818 = vmatmul.mubr.msk.bf16.vlgmr.msra.gmra.mxu0 %vm2226_vm6, %v2609_v14  ;;  %3831 = vmatprep.subr.bf16.mxu1 %v4896_v8 }
 0x296   :  { %3853 = vmatprep.mubr.msk.bf16.mxu0 %vm4020_vm5, %v4896_v8  ;;  %3842 = vmatpush3.bf16.msra.mxu0 %v2866_v28 }
 0x297   :  { %3843 = vmatprep.subr.bf16.mxu0 %v4896_v8 }
 0x298   :  { %3832 = vmatpush3.bf16.msra.mxu1 %v3984_v24 }
 0x299   :  { %3833 = vmatprep.subr.bf16.mxu1 %v4896_v8 }
 0x29a   :  { %3844 = vmatpush3.bf16.msra.mxu0 %v3988_v29 }
 0x29b   :  { %3845 = vmatprep.subr.bf16.mxu0 %v4896_v8 }
 0x29c   :  { %3834 = vmatpush3.bf16.msra.mxu1 %v3985_v25 }
 0x29d   :  { %3835 = vmatprep.subr.bf16.mxu1 %v4896_v8 }
 0x29e   :  { %3846 = vmatpush3.bf16.msra.mxu0 %v3989_v30 }
 0x29f   :  { %3847 = vmatprep.subr.bf16.mxu0 %v4896_v8 }
 0x2a0   :  { %3836 = vmatpush3.bf16.msra.mxu1 %v3986_v27 }
 0x2a2   :  { %3848 = vmatpush3.bf16.msra.mxu0 %v3990_v7 }
 0x2a3   :  { %3849 = vmatprep.subr.bf16.mxu0 %v4896_v8 }
 0x2a6   :  { %3850 = vmatpush3.bf16.msra.mxu0 %v3991_v61 }
 0x2a7   :  { %3851 = vmatprep.subr.bf16.mxu0 %v4896_v8 }
 0x2aa   :  { %3852 = vmatpush3.bf16.msra.mxu0 %v3992_v62 }
 0x32d   :  { %v2332_v33 = vpop.f32.mrf.mxu0 }
 0x32e   :  { %v2405_v35 = vpop.f32.mrf.mxu1 }
 0x32f   :  { %v3763_v41 = vpop.f32.mrf.mxu0  ;;  %v2406_v44 = vadd.f32 %v2405_v35, %v2332_v33 }
 0x330   :  { %v3777_v32 = vpop.f32.mrf.mxu1 }
 0x331   :  { %v2335_v37 = vpop.f32.mrf.mxu0 }
 0x332   :  { %v2408_v26 = vpop.f32.mrf.mxu1 }
 0x333   :  { %v3764_v39 = vpop.f32.mrf.mxu0 }
 0x334   :  { %v3778_v34 = vpop.f32.mrf.mxu1 }
 0x341   :  { %v2495_v42 = vpop.f32.mrf.mxu0 }
 0x342   :  { %v2586_v43 = vpop.f32.mrf.mxu1  ;;  %v2501_v53 = vadd.f32 %v2495_v42, %v2406_v44 }
 0x343   :  { %v3791_v38 = vpop.f32.mrf.mxu0 }
 0x344   :  { %v3805_v31 = vpop.f32.mrf.mxu1  ;;  %v2592_v55 = vadd.f32 %v2586_v43, %v2501_v53 }
 0x345   :  { %v2498_v17 = vpop.f32.mrf.mxu0 }
 0x346   :  { %v2589_v40 = vpop.f32.mrf.mxu1 }
 0x347   :  { %v3792_v45 = vpop.f32.mrf.mxu0 }
 0x348   :  { %v3806_v47 = vpop.f32.mrf.mxu1 }
 0x355   :  { %v2677_v51 = vpop.f32.mrf.mxu0 }
 0x356   :  { %v2683_v46 = vadd.f32 %v2677_v51, %v2592_v55 }
 0x357   :  { %v3819_v18 = vpop.f32.mrf.mxu0 }
 0x358   :  { %v2691_v49 = vadd.f32 %v3266_v57, %v2683_v46 }
 0x359   :  { %v2680_v48 = vpop.f32.mrf.mxu0 }
 0x35a   :  { %v2692_v58 = vmax.f32 %v2691_v49, 0.0 }
 0x35b   :  { %v3820_v59 = vpop.f32.mrf.mxu0 }
 0x35c   :  { %v2708_v50 = vpack.c.bf16 %v2692_v58, %v2692_v58 }
 0x35e   :  { %3838 = vmatmul.mubr.msk.bf16.vlgmr.msra.gmra.mxu1 %vm2761_vm8, %v2708_v50 }
 0x41e   :  { %v2803_v63 = vpop.f32.mrf.mxu1 }
 0x41f   :  { %v2804_v6 = vadd.f32 %v3267_v60, %v2803_v63 }
 0x420   :  { %v3839_v56 = vpop.f32.mrf.mxu1 }
 0x421   :  { %v2809_v0 = vmax.f32 %v2804_v6, 0.0 }
 0x422   :  { %v2806_v1 = vpop.f32.mrf.mxu1 }
 0x423   :  { %v2821_v54 = vpack.c.bf16 %v2809_v0, %v2809_v0 }
 0x424   :  { %v3840_v2 = vpop.f32.mrf.mxu1 }
 0x425   :  { %3854 = vmatmul.mubr.msk.bf16.vlgmr.msra.gmra.mxu0 %vm1064_vm3, %v2821_v54 }
 0x4e5   :  { %v2902_v4 = vpop.f32.mrf.mxu0 }
 0x4e6   :  { %v2903_v8 = vadd.f32 %v3277_v3, %v2902_v4 }
 0x4e7   :  { %v3855_v5 = vpop.f32.mrf.mxu0 }
 0x4e8   :  { %v2908_v36 = vsel %vm1191_vm1, %v2903_v8, -inf }
 0x4e9   :  { %2909 = vmax.xlane.f32.xlu0 %v2908_v36  ;;  %v2905_v9 = vpop.f32.mrf.mxu0 }
 0x4eb   :  { %v3856_v10 = vpop.f32.mrf.mxu0 }
 0x572   :  { %v2910_v11 = vpop.xlane.xlu0 %2909 }
 0x573   :  { %v2911_v12 = vsub.f32 %v2903_v8, %v2910_v11 }
 0x575   :  { %v2912_v13 = vmul.f32 1.442695, %v2911_v12 }
 0x577   :  { %3993 = vpow2.f32 %v2912_v13 }
 0x584   :  { %v3994_v16 = vpop.eup %3993 }
 0x585   :  { %v2914_v14 = vsel %vm1191_vm1, %v3994_v16, 0.0 }
 0x586   :  { %2915 = vadd.xlane.f32.xlu0 %v2914_v14 }
 0x60f   :  { %v2916_v15 = vpop.xlane.xlu0 %2915 }
 0x610   :  { %3995 = vrcp.f32 %v2916_v15 }
 0x61d   :  { %v3996_v19 = vpop.eup %3995 }
 0x61e   :  { %v2918_v20 = vmul.f32 %v3996_v19, %v3994_v16 }
 0x620   :  { %2919 = vst [vmem:[#allocation4] sm:$0x3] %v2918_v20 }
 0x621   :  { %4008 = shalt.err (!%p4005_p4)
}
 0x622   :  { %2929 = dma.vmem_to_hbm [thread:$0]  %s2927_s11, 32, %s4861_s13, [#allocation5]  }
 0x623   :  { %4017 = dma.done.wait [#allocation5], 32  }
 0x624   :  { %4018 = vsyncadd [#allocation5], 4294967264 }
 0x625   :  { %2933 = vsyncpa [#allocation5], 1 }

</bundles_post_ra>
